<compile_context>
chip_gen: v7x
topology: tpu7x:2x2x1
jax: 0.10.0
libtpu: 0.0.40
codegen_flags: <defaults>
</compile_context>

<pallas_src>
import functools

import jax
import jax.numpy as jnp
from jax.experimental import pallas as pl
from jax.experimental.pallas import tpu as pltpu


def _mhsa_kernel(x_ref, wqkv_ref, bqkv_ref, wo_ref, bo_ref, o_ref,
                 qkv_ref, ctx_ref, *, num_heads, head_pad, batch_block):
    nh, dp = num_heads, head_pad
    koff = nh * dp
    voff = 2 * nh * dp

    for bi in range(batch_block):  # static; batch_block==1 except on v5e/v6e
        x = x_ref[bi]                                               # (C, N)

        # Fused QKV projection (1/sqrt(d) pre-folded into the Q rows) + bias.
        qkv_ref[...] = jnp.dot(
            wqkv_ref[...], x, preferred_element_type=jnp.float32) + bqkv_ref[...]

        def head_body(h, carry):
            q_off = pl.multiple_of(h * dp, dp)
            k_off = pl.multiple_of(koff + h * dp, dp)
            v_off = pl.multiple_of(voff + h * dp, dp)
            qh = qkv_ref[pl.ds(q_off, dp), :]                       # (dp, N)
            kh = qkv_ref[pl.ds(k_off, dp), :]                       # (dp, N)
            vh = qkv_ref[pl.ds(v_off, dp), :]                       # (dp, N)

            # s[m, n] = <k[:, m], q[:, n]>: keys on sublanes, queries on lanes,
            # so the softmax-over-keys reductions are (1, N) row vectors that
            # broadcast directly onto the (dp, N) context (no relayout).
            s = jax.lax.dot_general(
                kh, qh, (((0,), (0,)), ((), ())),
                preferred_element_type=jnp.float32)                 # (N, N)
            s = s - jnp.max(s, axis=0, keepdims=True)
            e = jnp.exp(s)

            # Deferred normalization: unnormalized exponentials go straight to
            # the ctx matmul; scale the small (dp, N) result by the exact
            # reciprocal of the (1, N) key-sum.
            inv_l = pl.reciprocal(jnp.sum(e, axis=0, keepdims=True))  # (1, N)
            ctx_ref[pl.ds(q_off, dp), :] = (
                jnp.dot(vh, e, preferred_element_type=jnp.float32) * inv_l)
            return carry

        jax.lax.fori_loop(0, nh, head_body, 0)

        # Output 1x1 conv + bias + residual; lane-dense (C, N) store.
        out = jnp.dot(wo_ref[...], ctx_ref[...],
                      preferred_element_type=jnp.float32) + bo_ref[...]
        o_ref[bi] = out + x


def _prep_weights(params, num_heads):
    """Fused / head-padded weights consumed by the kernel (built once, outside)."""
    wq, wk, wv, wo = params["wq"], params["wk"], params["wv"], params["wo"]
    bq = params["bq"].reshape(-1)
    bk = params["bk"].reshape(-1)
    bv = params["bv"].reshape(-1)
    bo = params["bo"].reshape(-1)
    C = wq.shape[0]
    nh = num_heads
    d = C // nh
    dp = -(-d // 8) * 8  # pad each head's channels up to a full sublane tile

    # Fold the 1/sqrt(d) attention scale into the Q projection (weight + bias).
    scale = 1.0 / (d ** 0.5)
    wq = wq * scale
    bq = bq * scale

    def pad_rows(w, b):
        w3 = jnp.pad(w.reshape(nh, d, C), ((0, 0), (0, dp - d), (0, 0)))
        b3 = jnp.pad(b.reshape(nh, d), ((0, 0), (0, dp - d)))
        return w3.reshape(nh * dp, C), b3.reshape(nh * dp)

    wq_p, bq_p = pad_rows(wq, bq)
    wk_p, bk_p = pad_rows(wk, bk)
    wv_p, bv_p = pad_rows(wv, bv)

    w_qkv = jnp.concatenate([wq_p, wk_p, wv_p], axis=0)              # (3*nh*dp, C)
    b_qkv = jnp.concatenate([bq_p, bk_p, bv_p], axis=0)[:, None]     # (3*nh*dp, 1)

    # Out projection: zero columns for padded head channels; bias separate.
    wo_p = jnp.pad(wo.reshape(C, nh, d),
                   ((0, 0), (0, 0), (0, dp - d))).reshape(C, nh * dp)  # (C, nh*dp)
    return w_qkv, b_qkv, wo_p, bo[:, None], d, dp


def multi_head_self_attention(x, params, num_heads=8, batch_block=1):
    """x: (B, C, H, W) float32. params: dict of (C,C) weights and (C,1) biases."""
    B, C, H, W = x.shape
    N = H * W
    nh = num_heads
    assert C % nh == 0
    assert B % batch_block == 0

    w_qkv, b_qkv, w_o, b_o, d, dp = _prep_weights(params, nh)
    x_flat = x.reshape(B, C, N)

    kernel = functools.partial(_mhsa_kernel, num_heads=nh, head_pad=dp,
                               batch_block=batch_block)

    flops = B * (2 * (3 * nh * dp) * C * N          # fused QKV matmul
                 + nh * 2 * (2 * dp * N * N)        # scores + ctx per head
                 + 2 * C * (nh * dp) * N)           # out projection
    bytes_accessed = 4 * (2 * B * C * N
                          + (3 * nh * dp) * (C + 1) + C * (nh * dp + 1))

    out_flat = pl.pallas_call(
        kernel,
        out_shape=jax.ShapeDtypeStruct((B, C, N), jnp.float32),
        grid=(B // batch_block,),
        in_specs=[
            pl.BlockSpec((batch_block, C, N), lambda b: (b, 0, 0)),  # x
            pl.BlockSpec((3 * nh * dp, C), lambda b: (0, 0)),        # fused QKV w
            pl.BlockSpec((3 * nh * dp, 1), lambda b: (0, 0)),        # fused QKV b
            pl.BlockSpec((C, nh * dp), lambda b: (0, 0)),            # out-conv w
            pl.BlockSpec((C, 1), lambda b: (0, 0)),                  # out-conv b
        ],
        out_specs=pl.BlockSpec((batch_block, C, N), lambda b: (b, 0, 0)),
        scratch_shapes=[
            pltpu.VMEM((3 * nh * dp, N), jnp.float32),   # fused QKV activations
            pltpu.VMEM((nh * dp, N), jnp.float32),       # per-head context concat
        ],
        compiler_params=pltpu.CompilerParams(
            dimension_semantics=("parallel",)),
        cost_estimate=pl.CostEstimate(
            flops=flops,
            transcendentals=B * nh * N * N,
            bytes_accessed=bytes_accessed),
    )(x_flat, w_qkv, b_qkv, w_o, b_o)

    return out_flat.reshape(B, C, H, W)


def _reference(x, params, num_heads=8):
    """Pure-JAX reference mirroring the PyTorch forward exactly."""
    B, C, H, W = x.shape
    N = H * W
    d = C // num_heads
    xf = x.reshape(B, C, N)

    def conv1x1(w, b):
        return jnp.einsum('oc,bcn->bon', w, xf) + b.reshape(1, C, 1)

    q = conv1x1(params["wq"], params["bq"]).reshape(B, num_heads, d, N).transpose(0, 1, 3, 2)
    k = conv1x1(params["wk"], params["bk"]).reshape(B, num_heads, d, N).transpose(0, 1, 3, 2)
    v = conv1x1(params["wv"], params["bv"]).reshape(B, num_heads, d, N).transpose(0, 1, 3, 2)

    scores = jnp.einsum('bhnd,bhmd->bhnm', q, k) / (d ** 0.5)
    probs = jax.nn.softmax(scores, axis=-1)
    ctx = jnp.einsum('bhnm,bhmd->bhnd', probs, v)
    ctx = ctx.transpose(0, 1, 3, 2).reshape(B, C, N)
    out = jnp.einsum('oc,bcn->bon', params["wo"], ctx) + params["bo"].reshape(1, C, 1)
    return (out + xf).reshape(B, C, H, W)


def init_params(key, in_channels):
    C = in_channels
    ks = jax.random.split(key, 8)
    scale = 1.0 / (C ** 0.5)
    p = {}
    for i, name in enumerate(["q", "k", "v", "o"]):
        p[f"w{name}"] = jax.random.uniform(
            ks[2 * i], (C, C), jnp.float32, -scale, scale)
        p[f"b{name}"] = jax.random.uniform(
            ks[2 * i + 1], (C, 1), jnp.float32, -scale, scale)
    return p


if __name__ == "__main__":
    key = jax.random.PRNGKey(0)
    k_x, k_p = jax.random.split(key)

    B, C, H, W = 2, 32, 16, 16
    NUM_HEADS = 8

    x = jax.random.normal(k_x, (B, C, H, W), dtype=jnp.float32)
    params = init_params(k_p, C)

    ref = _reference(x, params, num_heads=NUM_HEADS)

    # Default path: one batch element per grid step ("parallel" -> both v7x TCs).
    out = multi_head_self_attention(x, params, num_heads=NUM_HEADS)
    out = jax.block_until_ready(out)
    assert out.shape == (B, C, H, W)
    assert jnp.allclose(out, ref, atol=1e-3, rtol=1e-3)

    # v5e/v6e-style packing: two batch elements per grid step (same kernel body).
    out2 = multi_head_self_attention(x, params, num_heads=NUM_HEADS, batch_block=2)
    out2 = jax.block_until_ready(out2)
    assert jnp.allclose(out2, ref, atol=1e-3, rtol=1e-3)

    print("KERNEL_OK")
</pallas_src>

<mosaic_0001>
module attributes {stable_mosaic.version = 11 : i64} {
  func.func @_mhsa_kernel(%arg0: i32, %arg1: memref<1x32x256xf32, #tpu.memory_space<vmem>>, %arg2: memref<192x32xf32, #tpu.memory_space<vmem>>, %arg3: memref<192x1xf32, #tpu.memory_space<vmem>>, %arg4: memref<32x64xf32, #tpu.memory_space<vmem>>, %arg5: memref<32x1xf32, #tpu.memory_space<vmem>>, %arg6: memref<1x32x256xf32, #tpu.memory_space<vmem>>, %arg7: memref<192x256xf32, #tpu.memory_space<vmem>>, %arg8: memref<64x256xf32, #tpu.memory_space<vmem>>) attributes {dimension_semantics = [#tpu.dimension_semantics<parallel>], iteration_bounds = array<i64: 2>, scalar_prefetch = 0 : i64, scratch_operands = 2 : i64, tpu.core_type = #tpu.core_type<tc>, window_params = [{transform_indices = @transform_0, window_bounds = array<i64: 1, 32, 256>}, {pipeline_mode = #tpu.pipeline_mode<synchronous>, transform_indices = @transform_1, window_bounds = array<i64: 192, 32>}, {pipeline_mode = #tpu.pipeline_mode<synchronous>, transform_indices = @transform_2, window_bounds = array<i64: 192, 1>}, {pipeline_mode = #tpu.pipeline_mode<synchronous>, transform_indices = @transform_3, window_bounds = array<i64: 32, 64>}, {pipeline_mode = #tpu.pipeline_mode<synchronous>, transform_indices = @transform_4, window_bounds = array<i64: 32, 1>}, {transform_indices = @transform_5, window_bounds = array<i64: 1, 32, 256>}]} {
    %c0 = arith.constant 0 : index
    %c0_0 = arith.constant 0 : index
    %c0_1 = arith.constant 0 : index
    %0 = vector.load %arg1[%c0, %c0_0, %c0_1] : memref<1x32x256xf32, #tpu.memory_space<vmem>>, vector<1x32x256xf32>
    %1 = vector.shape_cast %0 : vector<1x32x256xf32> to vector<32x256xf32>
    %c0_2 = arith.constant 0 : index
    %c0_3 = arith.constant 0 : index
    %2 = vector.load %arg2[%c0_2, %c0_3] : memref<192x32xf32, #tpu.memory_space<vmem>>, vector<192x32xf32>
    %cst = arith.constant dense<0.000000e+00> : vector<192x256xf32>
    %3 = tpu.matmul %2, %1, %cst {dimension_numbers = #tpu.dot_dimension_numbers<[1], [0], [0], [1], [0, 0, 1, 1], [], []>} : vector<192x32xf32>, vector<32x256xf32>, vector<192x256xf32> -> vector<192x256xf32>
    %c0_4 = arith.constant 0 : index
    %c0_5 = arith.constant 0 : index
    %4 = vector.load %arg3[%c0_4, %c0_5] : memref<192x1xf32, #tpu.memory_space<vmem>>, vector<192x1xf32>
    %5 = vector.broadcast %4 : vector<192x1xf32> to vector<192x256xf32>
    %6 = arith.addf %3, %5 : vector<192x256xf32>
    %c0_6 = arith.constant 0 : index
    %c0_7 = arith.constant 0 : index
    %7 = vector.load %arg7[%c0_6, %c0_7] : memref<192x256xf32, #tpu.memory_space<vmem>>, vector<192x256xf32>
    tpu.vector_store %arg7[%c0_6, %c0_7], %6 {strides = array<i32>} : memref<192x256xf32, #tpu.memory_space<vmem>>, vector<192x256xf32>,
    %c0_i32 = arith.constant 0 : i32
    %c8_i32 = arith.constant 8 : i32
    %8 = arith.addi %c0_i32, %c8_i32 : i32
    %c1_i32 = arith.constant 1 : i32
    scf.for %arg9 = %c0_i32 to %8 step %c1_i32  : i32 {
      %c8_i32_19 = arith.constant 8 : i32
      %19 = arith.muli %arg9, %c8_i32_19 : i32
      %20 = tpu.assume_multiple %19, 8 : i32
      %c8_i32_20 = arith.constant 8 : i32
      %21 = arith.muli %arg9, %c8_i32_20 : i32
      %c64_i32 = arith.constant 64 : i32
      %22 = arith.addi %c64_i32, %21 : i32
      %23 = tpu.assume_multiple %22, 8 : i32
      %c8_i32_21 = arith.constant 8 : i32
      %24 = arith.muli %arg9, %c8_i32_21 : i32
      %c128_i32 = arith.constant 128 : i32
      %25 = arith.addi %c128_i32, %24 : i32
      %26 = tpu.assume_multiple %25, 8 : i32
      %27 = arith.index_cast %20 : i32 to index
      %c0_22 = arith.constant 0 : index
      %28 = vector.load %arg7[%27, %c0_22] : memref<192x256xf32, #tpu.memory_space<vmem>>, vector<8x256xf32>
      %29 = arith.index_cast %23 : i32 to index
      %c0_23 = arith.constant 0 : index
      %30 = vector.load %arg7[%29, %c0_23] : memref<192x256xf32, #tpu.memory_space<vmem>>, vector<8x256xf32>
      %31 = arith.index_cast %26 : i32 to index
      %c0_24 = arith.constant 0 : index
      %32 = vector.load %arg7[%31, %c0_24] : memref<192x256xf32, #tpu.memory_space<vmem>>, vector<8x256xf32>
      %cst_25 = arith.constant dense<0.000000e+00> : vector<256x256xf32>
      %33 = tpu.matmul %30, %28, %cst_25 {dimension_numbers = #tpu.dot_dimension_numbers<[0], [0], [1], [1], [0, 1, 1, 1], [], []>} : vector<8x256xf32>, vector<8x256xf32>, vector<256x256xf32> -> vector<256x256xf32>
      %cst_26 = arith.constant dense<0xFF800000> : vector<256xf32>
      %34 = vector.multi_reduction <maximumf>, %33, %cst_26 [0] : vector<256x256xf32> to vector<256xf32>
      %35 = vector.shape_cast %34 : vector<256xf32> to vector<1x256xf32>
      %36 = vector.broadcast %35 : vector<1x256xf32> to vector<256x256xf32>
      %37 = arith.subf %33, %36 : vector<256x256xf32>
      %38 = math.exp %37 : vector<256x256xf32>
      %cst_27 = arith.constant dense<0.000000e+00> : vector<256xf32>
      %39 = vector.multi_reduction <add>, %38, %cst_27 [0] : vector<256x256xf32> to vector<256xf32>
      %40 = vector.shape_cast %39 : vector<256xf32> to vector<1x256xf32>
      %41 = tpu.reciprocal %40 : vector<1x256xf32> -> vector<1x256xf32>
      %cst_28 = arith.constant dense<0.000000e+00> : vector<8x256xf32>
      %42 = tpu.matmul %32, %38, %cst_28 {dimension_numbers = #tpu.dot_dimension_numbers<[1], [0], [0], [1], [0, 0, 1, 1], [], []>} : vector<8x256xf32>, vector<256x256xf32>, vector<8x256xf32> -> vector<8x256xf32>
      %43 = vector.broadcast %41 : vector<1x256xf32> to vector<8x256xf32>
      %44 = arith.mulf %42, %43 : vector<8x256xf32>
      %45 = arith.index_cast %20 : i32 to index
      %c0_29 = arith.constant 0 : index
      %46 = vector.load %arg8[%45, %c0_29] : memref<64x256xf32, #tpu.memory_space<vmem>>, vector<8x256xf32>
      tpu.vector_store %arg8[%45, %c0_29], %44 {strides = array<i32>} : memref<64x256xf32, #tpu.memory_space<vmem>>, vector<8x256xf32>,
    }
    %c8_i32_8 = arith.constant 8 : i32
    %c0_9 = arith.constant 0 : index
    %c0_10 = arith.constant 0 : index
    %9 = vector.load %arg4[%c0_9, %c0_10] : memref<32x64xf32, #tpu.memory_space<vmem>>, vector<32x64xf32>
    %c0_11 = arith.constant 0 : index
    %c0_12 = arith.constant 0 : index
    %10 = vector.load %arg8[%c0_11, %c0_12] : memref<64x256xf32, #tpu.memory_space<vmem>>, vector<64x256xf32>
    %cst_13 = arith.constant dense<0.000000e+00> : vector<32x256xf32>
    %11 = tpu.matmul %9, %10, %cst_13 {dimension_numbers = #tpu.dot_dimension_numbers<[1], [0], [0], [1], [0, 0, 1, 1], [], []>} : vector<32x64xf32>, vector<64x256xf32>, vector<32x256xf32> -> vector<32x256xf32>
    %c0_14 = arith.constant 0 : index
    %c0_15 = arith.constant 0 : index
    %12 = vector.load %arg5[%c0_14, %c0_15] : memref<32x1xf32, #tpu.memory_space<vmem>>, vector<32x1xf32>
    %13 = vector.broadcast %12 : vector<32x1xf32> to vector<32x256xf32>
    %14 = arith.addf %11, %13 : vector<32x256xf32>
    %15 = arith.addf %14, %1 : vector<32x256xf32>
    %c0_16 = arith.constant 0 : index
    %c0_17 = arith.constant 0 : index
    %c0_18 = arith.constant 0 : index
    %16 = vector.load %arg6[%c0_16, %c0_17, %c0_18] : memref<1x32x256xf32, #tpu.memory_space<vmem>>, vector<1x32x256xf32>
    %17 = vector.shape_cast %16 : vector<1x32x256xf32> to vector<32x256xf32>
    %18 = vector.shape_cast %15 : vector<32x256xf32> to vector<1x32x256xf32>
    tpu.vector_store %arg6[%c0_16, %c0_17, %c0_18], %18 {strides = array<i32>} : memref<1x32x256xf32, #tpu.memory_space<vmem>>, vector<1x32x256xf32>,
    return
  }
  func.func @transform_0(%arg0: i32) -> (i32, i32, i32) {
    %c0_i32 = arith.constant 0 : i32
    %c0_i32_0 = arith.constant 0 : i32
    %c0_i32_1 = arith.constant 0 : i32
    return %arg0, %c0_i32, %c0_i32_0 : i32, i32, i32
  }
  func.func @transform_1(%arg0: i32) -> (i32, i32) {
    %c0_i32 = arith.constant 0 : i32
    %c0_i32_0 = arith.constant 0 : i32
    %c0_i32_1 = arith.constant 0 : i32
    return %c0_i32, %c0_i32_0 : i32, i32
  }
  func.func @transform_2(%arg0: i32) -> (i32, i32) {
    %c0_i32 = arith.constant 0 : i32
    %c0_i32_0 = arith.constant 0 : i32
    %c0_i32_1 = arith.constant 0 : i32
    return %c0_i32, %c0_i32_0 : i32, i32
  }
  func.func @transform_3(%arg0: i32) -> (i32, i32) {
    %c0_i32 = arith.constant 0 : i32
    %c0_i32_0 = arith.constant 0 : i32
    %c0_i32_1 = arith.constant 0 : i32
    return %c0_i32, %c0_i32_0 : i32, i32
  }
  func.func @transform_4(%arg0: i32) -> (i32, i32) {
    %c0_i32 = arith.constant 0 : i32
    %c0_i32_0 = arith.constant 0 : i32
    %c0_i32_1 = arith.constant 0 : i32
    return %c0_i32, %c0_i32_0 : i32, i32
  }
  func.func @transform_5(%arg0: i32) -> (i32, i32, i32) {
    %c0_i32 = arith.constant 0 : i32
    %c0_i32_0 = arith.constant 0 : i32
    %c0_i32_1 = arith.constant 0 : i32
    return %arg0, %c0_i32, %c0_i32_0 : i32, i32, i32
  }
}

</mosaic_0001>

<bundles_post_ra>
// kernel: tpu_custom_call.1
= control target key start
LH: loop header
LB: loop body
LE: loop exit
PB: predicated region body
PF: predicated region fallthrough
CT: control target
= control target key end

     0   :  { %10 = vsyncpa [#allocation5], 0  ;;  %s3453_s0 = inlined_call_operand.vmem [shape: f32[2,32,256], index: 0, kind: input, shape index: {}]   ;;  %s3454_s1 = inlined_call_operand.vmem [shape: f32[192,32], index: 1, kind: input, shape index: {}]   ;;  %s3455_s2 = inlined_call_operand.vmem [shape: f32[192,1], index: 2, kind: input, shape index: {}]   ;;  %s3456_s3 = inlined_call_operand.vmem [shape: f32[32,64], index: 3, kind: input, shape index: {}]   ;;  %s3457_s4 = inlined_call_operand.vmem [shape: f32[32,1], index: 4, kind: input, shape index: {}]   ;;  %s3458_s5 = inlined_call_operand.hbm [shape: f32[2,32,256], index: 5, kind: output, shape index: {}]  }
   0x1   :  { %12 = vsyncpa [#allocation5 + $0x1], 0  ;;  %s2329_s18 = smov 0   ;;  %s2331_s19 = smov 0  }
   0x2   :  { %s2333_s20 = smov 0   ;;  %s2335_s21 = smov 0  }
   0x3 LB: > { %s2350_s22 = sadd.s32 4294967295, %s2287_s21   ;;  %s1847_s23 = sadd.s32 4294967294, %s2287_s21   ;;  %s2287_s21 = sphi %s2335_s21, %s3626_s21   ;;  %s2283_s20 = sphi %s2333_s20, %s3625_s20   ;;  %s2279_s19 = sphi %s2331_s19, %s3624_s19   ;;  %s2275_s18 = sphi %s2329_s18, %s3623_s18  }
   0x4   : > { %s2354_s24 = sadd.s32 1, %s2287_s21   ;;  %s135_s25 = sadd.s32 1, %s2283_s20 }
   0x5   : > { %s132_s26 = ssub.s32 %s2287_s21, %s2354_s24  ;;  %p145_p0 = scmp.ne.s32.totalorder %s2283_s20, %s2279_s19 }
   0x6   : > { %p133_p1 = scmp.eq.s32.totalorder %s132_s26, 0  ;;  %p146_p2 = scmp.eq.s32.totalorder %s2350_s22, 1 }
   0x7   : > { %p151_p3 = scmp.ne.s32.totalorder %s2279_s19, %s2275_s18  ;;  %p152_p4 = scmp.eq.s32.totalorder %s1847_s23, 1 }
   0x8   : > { %s2365_s27 = scalar_select %p133_p1, %s2283_s20, %s135_s25  }
   0x9   : > { %p2367_p5 = por %p146_p2, %p145_p0  ;;  %p2371_p6 = por %p152_p4, %p151_p3 }
   0xa   : > { %p1850_p7 = scmp.ge.s32.totalorder %s2287_s21, 1  ;;  %p190_p8 = scmp.lt.s32.totalorder %s2287_s21, 3 }
   0xc   : > { %p191_p9 = pnand %p1850_p7, %p190_p8 }
   0xe   : > { %194 = sbr.rel (%p191_p9) target bundleno = 1385 (0x569), region = 40 }
  0x15   : > { %s215_s30 = sand.u32 1, %s2279_s19   ;;  %p218_p10 = scmp.lt.s32.totalorder %s2350_s22, 1  ;;  %v3461_v0 = vmov 0.0   ;;  %v3459_v1 = vmov 0   ;;  %v257_v13 = vld [vmem:[%s3455_s2 + $0x10] sm:$0xff]  ;;  %v255_v14 = vld [vmem:[%s3455_s2] sm:$0xff] }
  0x16   : > { %s2381_s6 = sshll.u32 %s215_s30, 6  ;;  %536 = vmatprep.mubr.f32.mxu0 %v3461_v0  ;;  %608 = vmatprep.mubr.f32.mxu1 %v3461_v0  ;;  %v258_v16 = vld [vmem:[%s3455_s2 + $0x18] sm:$0xff]  ;;  %v256_v17 = vld [vmem:[%s3455_s2 + $0x8] sm:$0xff]  ;;  %v231_v18 = vld [vmem:[%s3454_s1] sm:$0xff]  ;;  %vm399_vm0 = vcmask 261120  }
  0x17   : > { %2086 = vset.pattern.permute.xlu1 %v3459_v1  ;;  %2085 = vset.pattern.permute.xlu0 %v3459_v1  ;;  %s219_s7 = scalar_select %p218_p10, %s2350_s22, 1  ;;  %v243_v19 = vld [vmem:[%s3454_s1 + $0x60] sm:$0xff]  ;;  %v260_v20 = vld [vmem:[%s3455_s2 + $0x28] sm:$0xff]  ;;  %v262_v24 = vld [vmem:[%s3455_s2 + $0x38] sm:$0xff] }
  0x18   : > { %291 = vperm.xlu1 %2086, %v257_v13   ;;  %281 = vperm.xlu0 %2085, %v255_v14   ;;  %v259_v21 = vld [vmem:[%s3455_s2 + $0x20] sm:$0xff]  ;;  %v232_v22 = vld [vmem:[%s3454_s1 + $0x8] sm:$0xff]  ;;  %v261_v25 = vld [vmem:[%s3455_s2 + $0x30] sm:$0xff]  ;;  %s2638_s10 = scalar_lea.vmem [#allocation4], %s2381_s6 }
  0x19   : > { %s1927_s8 = sshll.u32 %s219_s7, 6  ;;  %v244_v23 = vld [vmem:[%s3454_s1 + $0x68] sm:$0xff]  ;;  %v233_v26 = vld [vmem:[%s3454_s1 + $0x10] sm:$0xff]  ;;  %v263_v29 = vld [vmem:[%s3455_s2 + $0x40] sm:$0xff] }
  0x1a   : > { %s222_s11 = scalar_lea.vmem %s3453_s0, %s1927_s8  ;;  %v245_v27 = vld [vmem:[%s3454_s1 + $0x70] sm:$0xff]  ;;  %v264_v28 = vld [vmem:[%s3455_s2 + $0x48] sm:$0xff]  ;;  %v234_v30 = vld [vmem:[%s3454_s1 + $0x18] sm:$0xff] }
  0x1b   : > { %v2391_v2 = vld [vmem:[%s222_s11 + $0x8] sm:$0xff]  ;;  %v2393_v3 = vld [vmem:[%s222_s11 + $0x18] sm:$0xff]  ;;  %v2395_v4 = vld [vmem:[%s222_s11] sm:$0xff] }
  0x1c   : > { %3509 = vst [vmem:[#allocation7_spill] sm:$0xff] %v2391_v2  ;;  %3510 = vst [vmem:[#allocation8_spill] sm:$0xff] %v2393_v3  ;;  %v1933_v5 = vpack.c.bf16 %v2393_v3, %v2391_v2  ;;  %v2399_v6 = vld [vmem:[%s222_s11 + $0x10] sm:$0xff]  ;;  %v2401_v7 = vld [vmem:[%s222_s11 + $0x28] sm:$0xff]  ;;  %296 = vperm.xlu1 %2086, %v258_v16   ;;  %286 = vperm.xlu0 %2085, %v256_v17  }
  0x1d   : > { %3511 = vst [vmem:[#allocation9_spill] sm:$0xff] %v2395_v4  ;;  %3512 = vst [vmem:[#allocation10_spill] sm:$0xff] %v2399_v6  ;;  %v2403_v8 = vld [vmem:[%s222_s11 + $0x38] sm:$0xff]  ;;  %v1935_v9 = vpack.c.bf16 %v2399_v6, %v2395_v4  ;;  %v2409_v11 = vld [vmem:[%s222_s11 + $0x20] sm:$0xff] }
  0x1e   : > { %3513 = vst [vmem:[#allocation11_spill] sm:$0xff] %v2401_v7  ;;  %3514 = vst [vmem:[#allocation12_spill] sm:$0xff] %v2403_v8  ;;  %v1937_v10 = vpack.c.bf16 %v2403_v8, %v2401_v7  ;;  %v2411_v12 = vld [vmem:[%s222_s11 + $0x30] sm:$0xff]  ;;  %1934 = vmatprep.subr.bf16.mxu0 %v1933_v5  ;;  %2021 = vmatprep.subr.bf16.mxu1 %v1933_v5  ;;  %v246_v31 = vld [vmem:[%s3454_s1 + $0x78] sm:$0xff]  ;;  %s2640_s11 = smov 0  }
  0x1f   : > { %3515 = vst [vmem:[#allocation13_spill] sm:$0xff] %v2409_v11  ;;  %3516 = vst [vmem:[#allocation14_spill] sm:$0xff] %v2411_v12  ;;  %1936 = vmatpush1.bf16.msra.mxu0 %v1935_v9  ;;  %2023 = vmatpush1.bf16.msra.mxu1 %v1935_v9  ;;  %v1939_v15 = vpack.c.bf16 %v2411_v12, %v2409_v11  ;;  %v266_v32 = vld [vmem:[%s3455_s2 + $0x58] sm:$0xff]  ;;  %v265_v33 = vld [vmem:[%s3455_s2 + $0x50] sm:$0xff] }
  0x20   : > { %1938 = vmatprep.subr.bf16.mxu0 %v1937_v10  ;;  %2022 = vmatprep.subr.bf16.mxu1 %v1937_v10  ;;  %v235_v34 = vld [vmem:[%s3454_s1 + $0x20] sm:$0xff]  ;;  %v268_v36 = vld [vmem:[%s3455_s2 + $0x68] sm:$0xff]  ;;  %v270_v40 = vld [vmem:[%s3455_s2 + $0x78] sm:$0xff] }
  0x21   : > { %306 = vperm.xlu1 %2086, %v260_v20   ;;  %301 = vperm.xlu0 %2085, %v259_v21   ;;  %v247_v35 = vld [vmem:[%s3454_s1 + $0x80] sm:$0xff]  ;;  %v236_v38 = vld [vmem:[%s3454_s1 + $0x28] sm:$0xff]  ;;  %v269_v41 = vld [vmem:[%s3455_s2 + $0x70] sm:$0xff] }
  0x22   : > { %v267_v37 = vld [vmem:[%s3455_s2 + $0x60] sm:$0xff]  ;;  %v248_v39 = vld [vmem:[%s3454_s1 + $0x88] sm:$0xff]  ;;  %v237_v42 = vld [vmem:[%s3454_s1 + $0x30] sm:$0xff] }
  0x23   : > { %1940 = vmatpush1.bf16.msra.mxu0 %v1939_v15  ;;  %2024 = vmatpush1.bf16.msra.mxu1 %v1939_v15  ;;  %v249_v43 = vld [vmem:[%s3454_s1 + $0x90] sm:$0xff]  ;;  %v272_v44 = vld [vmem:[%s3455_s2 + $0x88] sm:$0xff]  ;;  %v271_v45 = vld [vmem:[%s3455_s2 + $0x80] sm:$0xff] }
  0x24   : > { %v238_v46 = vld [vmem:[%s3454_s1 + $0x38] sm:$0xff]  ;;  %v273_v49 = vld [vmem:[%s3455_s2 + $0x90] sm:$0xff]  ;;  %v239_v50 = vld [vmem:[%s3454_s1 + $0x40] sm:$0xff] }
  0x25   : > { %316 = vperm.xlu1 %2086, %v262_v24   ;;  %311 = vperm.xlu0 %2085, %v261_v25   ;;  %v250_v47 = vld [vmem:[%s3454_s1 + $0x98] sm:$0xff]  ;;  %v251_v51 = vld [vmem:[%s3454_s1 + $0xa0] sm:$0xff]  ;;  %v276_v52 = vld [vmem:[%s3455_s2 + $0xa8] sm:$0xff] }
  0x26   : > { %1854 = vmatmul.mubr.msk.f32.vlgmr.msra.gmra.mrb[0].mxu0 %vm399_vm0, %v231_v18  ;;  %1866 = vmatmul.mubr.msk.f32.vlgmr.msra.gmra.mrb[0].mxu1 %vm399_vm0, %v243_v19  ;;  %v274_v48 = vld [vmem:[%s3455_s2 + $0x98] sm:$0xff]  ;;  %v275_v53 = vld [vmem:[%s3455_s2 + $0xa0] sm:$0xff]  ;;  %v240_v54 = vld [vmem:[%s3454_s1 + $0x48] sm:$0xff] }
  0x27   : > { %542 = vmatprep.mubr.f32.mxu0 %v3461_v0  ;;  %614 = vmatprep.mubr.f32.mxu1 %v3461_v0  ;;  %v252_v55 = vld [vmem:[%s3454_s1 + $0xa8] sm:$0xff]  ;;  %v278_v56 = vld [vmem:[%s3455_s2 + $0xb8] sm:$0xff]  ;;  %v277_v57 = vld [vmem:[%s3455_s2 + $0xb0] sm:$0xff] }
  0x28   : > { %v241_v58 = vld [vmem:[%s3454_s1 + $0x50] sm:$0xff]  ;;  %v242_v60 = vld [vmem:[%s3454_s1 + $0x58] sm:$0xff] }
  0x29   : > { %326 = vperm.xlu1 %2086, %v264_v28   ;;  %321 = vperm.xlu0 %2085, %v263_v29   ;;  %v253_v59 = vld [vmem:[%s3454_s1 + $0xb0] sm:$0xff]  ;;  %v254_v61 = vld [vmem:[%s3454_s1 + $0xb8] sm:$0xff] }
  0x2a   : > { %1855 = vmatmul.mubr.msk.f32.gmra.mrb[2].mxu0 %vm399_vm0, %v232_v22  ;;  %1867 = vmatmul.mubr.msk.f32.gmra.mrb[2].mxu1 %vm399_vm0, %v244_v23 }
  0x2b   : > { %548 = vmatprep.mubr.f32.mxu0 %v3461_v0  ;;  %620 = vmatprep.mubr.f32.mxu1 %v3461_v0 }
  0x2d   : > { %336 = vperm.xlu1 %2086, %v266_v32   ;;  %331 = vperm.xlu0 %2085, %v265_v33  }
  0x2e   : > { %1856 = vmatmul.mubr.msk.f32.gmra.mrb[4].mxu0 %vm399_vm0, %v233_v26  ;;  %1868 = vmatmul.mubr.msk.f32.gmra.mrb[4].mxu1 %vm399_vm0, %v245_v27 }
  0x2f   : > { %554 = vmatprep.mubr.f32.mxu0 %v3461_v0  ;;  %626 = vmatprep.mubr.f32.mxu1 %v3461_v0 }
  0x31   : > { %346 = vperm.xlu1 %2086, %v268_v36   ;;  %341 = vperm.xlu0 %2085, %v267_v37  }
  0x32   : > { %1857 = vmatmul.mubr.msk.f32.gmra.mrb[6].mxu0 %vm399_vm0, %v234_v30  ;;  %1869 = vmatmul.mubr.msk.f32.gmra.mrb[6].mxu1 %vm399_vm0, %v246_v31 }
  0x33   : > { %560 = vmatprep.mubr.f32.mxu0 %v3461_v0  ;;  %632 = vmatprep.mubr.f32.mxu1 %v3461_v0 }
  0x35   : > { %356 = vperm.xlu1 %2086, %v270_v40   ;;  %351 = vperm.xlu0 %2085, %v269_v41  }
  0x36   : > { %1858 = vmatmul.mubr.msk.f32.gmra.mrb[8].mxu0 %vm399_vm0, %v235_v34  ;;  %1870 = vmatmul.mubr.msk.f32.gmra.mrb[8].mxu1 %vm399_vm0, %v247_v35 }
  0x37   : > { %566 = vmatprep.mubr.f32.mxu0 %v3461_v0  ;;  %638 = vmatprep.mubr.f32.mxu1 %v3461_v0 }
  0x39   : > { %366 = vperm.xlu1 %2086, %v272_v44   ;;  %361 = vperm.xlu0 %2085, %v271_v45  }
  0x3a   : > { %1859 = vmatmul.mubr.msk.f32.gmra.mrb[10].mxu0 %vm399_vm0, %v236_v38  ;;  %1871 = vmatmul.mubr.msk.f32.gmra.mrb[10].mxu1 %vm399_vm0, %v248_v39 }
  0x3b   : > { %572 = vmatprep.mubr.f32.mxu0 %v3461_v0  ;;  %644 = vmatprep.mubr.f32.mxu1 %v3461_v0 }
  0x3d   : > { %376 = vperm.xlu1 %2086, %v274_v48   ;;  %371 = vperm.xlu0 %2085, %v273_v49  }
  0x3e   : > { %1860 = vmatmul.mubr.msk.f32.gmra.mrb[12].mxu0 %vm399_vm0, %v237_v42  ;;  %1872 = vmatmul.mubr.msk.f32.gmra.mrb[12].mxu1 %vm399_vm0, %v249_v43 }
  0x3f   : > { %578 = vmatprep.mubr.f32.mxu0 %v3461_v0  ;;  %650 = vmatprep.mubr.f32.mxu1 %v3461_v0 }
  0x41   : > { %386 = vperm.xlu1 %2086, %v276_v52   ;;  %381 = vperm.xlu0 %2085, %v275_v53  }
  0x42   : > { %1861 = vmatmul.mubr.msk.f32.gmra.mrb[14].mxu0 %vm399_vm0, %v238_v46  ;;  %1873 = vmatmul.mubr.msk.f32.gmra.mrb[14].mxu1 %vm399_vm0, %v250_v47 }
  0x43   : > { %584 = vmatprep.mubr.f32.mxu0 %v3461_v0  ;;  %656 = vmatprep.mubr.f32.mxu1 %v3461_v0 }
  0x45   : > { %396 = vperm.xlu1 %2086, %v278_v56   ;;  %391 = vperm.xlu0 %2085, %v277_v57  }
  0x46   : > { %1862 = vmatmul.mubr.msk.f32.gmra.mrb[16].mxu0 %vm399_vm0, %v239_v50  ;;  %1874 = vmatmul.mubr.msk.f32.gmra.mrb[16].mxu1 %vm399_vm0, %v251_v51 }
  0x47   : > { %590 = vmatprep.mubr.f32.mxu0 %v3461_v0  ;;  %662 = vmatprep.mubr.f32.mxu1 %v3461_v0 }
  0x4a   : > { %1863 = vmatmul.mubr.msk.f32.gmra.mrb[18].mxu0 %vm399_vm0, %v240_v54  ;;  %1875 = vmatmul.mubr.msk.f32.gmra.mrb[18].mxu1 %vm399_vm0, %v252_v55 }
  0x4b   : > { %596 = vmatprep.mubr.f32.mxu0 %v3461_v0  ;;  %668 = vmatprep.mubr.f32.mxu1 %v3461_v0 }
  0x4e   : > { %1864 = vmatmul.mubr.msk.f32.gmra.mrb[20].mxu0 %vm399_vm0, %v241_v58  ;;  %1876 = vmatmul.mubr.msk.f32.gmra.mrb[20].mxu1 %vm399_vm0, %v253_v59 }
  0x4f   : > { %602 = vmatprep.mubr.f32.mxu0 %v3461_v0  ;;  %674 = vmatprep.mubr.f32.mxu1 %v3461_v0 }
  0x52   : > { %1865 = vmatmul.mubr.msk.f32.gmra.mrb[22].mxu0 %vm399_vm0, %v242_v60  ;;  %1877 = vmatmul.mubr.msk.f32.gmra.mrb[22].mxu1 %vm399_vm0, %v254_v61 }
  0x97   : > { %v282_v62 = vpop.permute.xlu0 %281  ;;  %v292_v63 = vpop.permute.xlu1 %291 }
  0x9b   : > { %v287_v5 = vpop.permute.xlu0 %286  ;;  %v297_v9 = vpop.permute.xlu1 %296 }
  0xa0   : > { %v2605_v10 = vpop.permute.xlu0 %301  ;;  %v2607_v13 = vpop.permute.xlu1 %306 }
  0xa4   : > { %v2609_v14 = vpop.permute.xlu0 %311  ;;  %v2611_v15 = vpop.permute.xlu1 %316 }
  0xa8   : > { %v2613_v16 = vpop.permute.xlu0 %321  ;;  %v2615_v17 = vpop.permute.xlu1 %326 }
  0xac   : > { %v2617_v18 = vpop.permute.xlu0 %331  ;;  %v2619_v19 = vpop.permute.xlu1 %336 }
  0xb0   : > { %v342_v20 = vpop.permute.xlu0 %341  ;;  %v347_v29 = vpop.permute.xlu1 %346 }
  0xb4   : > { %v352_v38 = vpop.permute.xlu0 %351  ;;  %v357_v47 = vpop.permute.xlu1 %356 }
  0xb8   : > { %v362_v56 = vpop.permute.xlu0 %361 }
  0xf9   : > { %v538_v21 = vpop.f32.mrb[0].mxu0  ;;  %v610_v22 = vpop.f32.mrb[0].mxu1 }
  0xfa   : > { %v539_v23 = vadd.f32 %v538_v21, %v282_v62  ;;  %v611_v24 = vadd.f32 %v610_v22, %v342_v20  ;;  %v540_v25 = vpop.f32.mrb[1].mxu0  ;;  %v612_v26 = vpop.f32.mrb[1].mxu1 }
  0xfb   : > { %v541_v27 = vadd.f32 %v540_v25, %v282_v62  ;;  %v613_v28 = vadd.f32 %v612_v26, %v342_v20  ;;  %v367_v20 = vpop.permute.xlu1 %366 }
  0xfc   : > { %681 = vst [vmem:[#allocation2] sm:$0xff] %v539_v23  ;;  %705 = vst [vmem:[#allocation2 + $0xc0] sm:$0xff] %v611_v24 }
  0xfd   : > { %682 = vst [vmem:[#allocation2 + $0x8] sm:$0xff] %v541_v27  ;;  %706 = vst [vmem:[#allocation2 + $0xc8] sm:$0xff] %v613_v28  ;;  %v544_v30 = vpop.f32.mrb[2].mxu0  ;;  %v616_v31 = vpop.f32.mrb[2].mxu1 }
  0xfe   : > { %v545_v32 = vadd.f32 %v544_v30, %v287_v5  ;;  %v617_v33 = vadd.f32 %v616_v31, %v347_v29  ;;  %v546_v34 = vpop.f32.mrb[3].mxu0  ;;  %v618_v35 = vpop.f32.mrb[3].mxu1 }
  0xff   : > { %v547_v36 = vadd.f32 %v546_v34, %v287_v5  ;;  %v619_v37 = vadd.f32 %v618_v35, %v347_v29  ;;  %v372_v28 = vpop.permute.xlu0 %371 }
 0x100   : > { %683 = vst [vmem:[#allocation2 + $0x10] sm:$0xff] %v545_v32  ;;  %707 = vst [vmem:[#allocation2 + $0xd0] sm:$0xff] %v617_v33 }
 0x101   : > { %684 = vst [vmem:[#allocation2 + $0x18] sm:$0xff] %v547_v36  ;;  %708 = vst [vmem:[#allocation2 + $0xd8] sm:$0xff] %v619_v37  ;;  %v550_v39 = vpop.f32.mrb[4].mxu0  ;;  %v622_v40 = vpop.f32.mrb[4].mxu1 }
 0x102   : > { %v551_v41 = vadd.f32 %v550_v39, %v292_v63  ;;  %v623_v42 = vadd.f32 %v622_v40, %v352_v38  ;;  %v552_v43 = vpop.f32.mrb[5].mxu0  ;;  %v624_v44 = vpop.f32.mrb[5].mxu1 }
 0x103   : > { %v553_v45 = vadd.f32 %v552_v43, %v292_v63  ;;  %v625_v46 = vadd.f32 %v624_v44, %v352_v38  ;;  %v377_v36 = vpop.permute.xlu1 %376  ;;  %v382_v44 = vpop.permute.xlu0 %381 }
 0x104   : > { %685 = vst [vmem:[#allocation2 + $0x20] sm:$0xff] %v551_v41  ;;  %709 = vst [vmem:[#allocation2 + $0xe0] sm:$0xff] %v623_v42 }
 0x105   : > { %686 = vst [vmem:[#allocation2 + $0x28] sm:$0xff] %v553_v45  ;;  %710 = vst [vmem:[#allocation2 + $0xe8] sm:$0xff] %v625_v46  ;;  %v556_v48 = vpop.f32.mrb[6].mxu0  ;;  %v628_v49 = vpop.f32.mrb[6].mxu1 }
 0x106   : > { %v557_v50 = vadd.f32 %v556_v48, %v297_v9  ;;  %v629_v51 = vadd.f32 %v628_v49, %v357_v47  ;;  %v558_v52 = vpop.f32.mrb[7].mxu0  ;;  %v630_v53 = vpop.f32.mrb[7].mxu1 }
 0x107   : > { %v559_v54 = vadd.f32 %v558_v52, %v297_v9  ;;  %v631_v55 = vadd.f32 %v630_v53, %v357_v47  ;;  %v387_v52 = vpop.permute.xlu1 %386 }
 0x108   : > { %687 = vst [vmem:[#allocation2 + $0x30] sm:$0xff] %v557_v50  ;;  %711 = vst [vmem:[#allocation2 + $0xf0] sm:$0xff] %v629_v51 }
 0x109   : > { %688 = vst [vmem:[#allocation2 + $0x38] sm:$0xff] %v559_v54  ;;  %712 = vst [vmem:[#allocation2 + $0xf8] sm:$0xff] %v631_v55  ;;  %v562_v57 = vpop.f32.mrb[8].mxu0  ;;  %v634_v58 = vpop.f32.mrb[8].mxu1 }
 0x10a   : > { %v563_v59 = vadd.f32 %v562_v57, %v2605_v10  ;;  %v635_v60 = vadd.f32 %v634_v58, %v362_v56  ;;  %v564_v61 = vpop.f32.mrb[9].mxu0  ;;  %v636_v62 = vpop.f32.mrb[9].mxu1 }
 0x10b   : > { %v565_v63 = vadd.f32 %v564_v61, %v2605_v10  ;;  %v637_v5 = vadd.f32 %v636_v62, %v362_v56 }
 0x10c   : > { %689 = vst [vmem:[#allocation2 + $0x40] sm:$0xff] %v563_v59  ;;  %713 = vst [vmem:[#allocation2 + $0x100] sm:$0xff] %v635_v60  ;;  %v392_v60 = vpop.permute.xlu0 %391 }
 0x10d   : > { %690 = vst [vmem:[#allocation2 + $0x48] sm:$0xff] %v565_v63  ;;  %714 = vst [vmem:[#allocation2 + $0x108] sm:$0xff] %v637_v5  ;;  %v568_v9 = vpop.f32.mrb[10].mxu0  ;;  %v640_v21 = vpop.f32.mrb[10].mxu1 }
 0x10e   : > { %v569_v22 = vadd.f32 %v568_v9, %v2607_v13  ;;  %v641_v23 = vadd.f32 %v640_v21, %v367_v20  ;;  %v570_v24 = vpop.f32.mrb[11].mxu0  ;;  %v642_v25 = vpop.f32.mrb[11].mxu1 }
 0x10f   : > { %v571_v26 = vadd.f32 %v570_v24, %v2607_v13  ;;  %v643_v27 = vadd.f32 %v642_v25, %v367_v20 }
 0x110   : > { %691 = vst [vmem:[#allocation2 + $0x50] sm:$0xff] %v569_v22  ;;  %715 = vst [vmem:[#allocation2 + $0x110] sm:$0xff] %v641_v23  ;;  %v397_v22 = vpop.permute.xlu1 %396 }
 0x111   : > { %692 = vst [vmem:[#allocation2 + $0x58] sm:$0xff] %v571_v26  ;;  %716 = vst [vmem:[#allocation2 + $0x118] sm:$0xff] %v643_v27  ;;  %v574_v10 = vpop.f32.mrb[12].mxu0  ;;  %v646_v29 = vpop.f32.mrb[12].mxu1 }
 0x112   : > { %v575_v30 = vadd.f32 %v574_v10, %v2609_v14  ;;  %v647_v31 = vadd.f32 %v646_v29, %v372_v28  ;;  %v576_v32 = vpop.f32.mrb[13].mxu0  ;;  %v648_v33 = vpop.f32.mrb[13].mxu1 }
 0x113   : > { %v577_v34 = vadd.f32 %v576_v32, %v2609_v14  ;;  %v649_v35 = vadd.f32 %v648_v33, %v372_v28 }
 0x114   : > { %693 = vst [vmem:[#allocation2 + $0x60] sm:$0xff] %v575_v30  ;;  %717 = vst [vmem:[#allocation2 + $0x120] sm:$0xff] %v647_v31 }
 0x115   : > { %694 = vst [vmem:[#allocation2 + $0x68] sm:$0xff] %v577_v34  ;;  %718 = vst [vmem:[#allocation2 + $0x128] sm:$0xff] %v649_v35  ;;  %v580_v13 = vpop.f32.mrb[14].mxu0  ;;  %v652_v37 = vpop.f32.mrb[14].mxu1 }
 0x116   : > { %v581_v38 = vadd.f32 %v580_v13, %v2611_v15  ;;  %v653_v39 = vadd.f32 %v652_v37, %v377_v36  ;;  %v582_v40 = vpop.f32.mrb[15].mxu0  ;;  %v654_v41 = vpop.f32.mrb[15].mxu1 }
 0x117   : > { %v583_v42 = vadd.f32 %v582_v40, %v2611_v15  ;;  %v655_v43 = vadd.f32 %v654_v41, %v377_v36 }
 0x118   : > { %695 = vst [vmem:[#allocation2 + $0x70] sm:$0xff] %v581_v38  ;;  %719 = vst [vmem:[#allocation2 + $0x130] sm:$0xff] %v653_v39 }
 0x119   : > { %696 = vst [vmem:[#allocation2 + $0x78] sm:$0xff] %v583_v42  ;;  %720 = vst [vmem:[#allocation2 + $0x138] sm:$0xff] %v655_v43  ;;  %v586_v14 = vpop.f32.mrb[16].mxu0  ;;  %v658_v45 = vpop.f32.mrb[16].mxu1 }
 0x11a   : > { %v587_v46 = vadd.f32 %v586_v14, %v2613_v16  ;;  %v659_v47 = vadd.f32 %v658_v45, %v382_v44  ;;  %v588_v48 = vpop.f32.mrb[17].mxu0  ;;  %v660_v49 = vpop.f32.mrb[17].mxu1 }
 0x11b   : > { %v589_v50 = vadd.f32 %v588_v48, %v2613_v16  ;;  %v661_v51 = vadd.f32 %v660_v49, %v382_v44 }
 0x11c   : > { %697 = vst [vmem:[#allocation2 + $0x80] sm:$0xff] %v587_v46  ;;  %721 = vst [vmem:[#allocation2 + $0x140] sm:$0xff] %v659_v47 }
 0x11d   : > { %698 = vst [vmem:[#allocation2 + $0x88] sm:$0xff] %v589_v50  ;;  %722 = vst [vmem:[#allocation2 + $0x148] sm:$0xff] %v661_v51  ;;  %v592_v15 = vpop.f32.mrb[18].mxu0  ;;  %v664_v53 = vpop.f32.mrb[18].mxu1 }
 0x11e   : > { %v593_v54 = vadd.f32 %v592_v15, %v2615_v17  ;;  %v665_v55 = vadd.f32 %v664_v53, %v387_v52  ;;  %v594_v56 = vpop.f32.mrb[19].mxu0  ;;  %v666_v57 = vpop.f32.mrb[19].mxu1 }
 0x11f   : > { %v595_v58 = vadd.f32 %v594_v56, %v2615_v17  ;;  %v667_v59 = vadd.f32 %v666_v57, %v387_v52 }
 0x120   : > { %699 = vst [vmem:[#allocation2 + $0x90] sm:$0xff] %v593_v54  ;;  %723 = vst [vmem:[#allocation2 + $0x150] sm:$0xff] %v665_v55 }
 0x121   : > { %700 = vst [vmem:[#allocation2 + $0x98] sm:$0xff] %v595_v58  ;;  %724 = vst [vmem:[#allocation2 + $0x158] sm:$0xff] %v667_v59  ;;  %v598_v16 = vpop.f32.mrb[20].mxu0  ;;  %v670_v61 = vpop.f32.mrb[20].mxu1 }
 0x122   : > { %v599_v62 = vadd.f32 %v598_v16, %v2617_v18  ;;  %v671_v63 = vadd.f32 %v670_v61, %v392_v60  ;;  %v600_v5 = vpop.f32.mrb[21].mxu0  ;;  %v672_v20 = vpop.f32.mrb[21].mxu1 }
 0x123   : > { %v601_v9 = vadd.f32 %v600_v5, %v2617_v18  ;;  %v673_v21 = vadd.f32 %v672_v20, %v392_v60 }
 0x124   : > { %701 = vst [vmem:[#allocation2 + $0xa0] sm:$0xff] %v599_v62  ;;  %725 = vst [vmem:[#allocation2 + $0x160] sm:$0xff] %v671_v63 }
 0x125   : > { %702 = vst [vmem:[#allocation2 + $0xa8] sm:$0xff] %v601_v9  ;;  %726 = vst [vmem:[#allocation2 + $0x168] sm:$0xff] %v673_v21  ;;  %v604_v17 = vpop.f32.mrb[22].mxu0  ;;  %v676_v23 = vpop.f32.mrb[22].mxu1 }
 0x126   : > { %v605_v24 = vadd.f32 %v604_v17, %v2619_v19  ;;  %v677_v25 = vadd.f32 %v676_v23, %v397_v22  ;;  %v606_v26 = vpop.f32.mrb[23].mxu0  ;;  %v678_v27 = vpop.f32.mrb[23].mxu1 }
 0x127   : > { %v607_v28 = vadd.f32 %v606_v26, %v2619_v19  ;;  %v679_v10 = vadd.f32 %v678_v27, %v397_v22 }
 0x128   : > { %703 = vst [vmem:[#allocation2 + $0xb0] sm:$0xff] %v605_v24  ;;  %727 = vst [vmem:[#allocation2 + $0x170] sm:$0xff] %v677_v25 }
 0x129   : > { %704 = vst [vmem:[#allocation2 + $0xb8] sm:$0xff] %v607_v28  ;;  %728 = vst [vmem:[#allocation2 + $0x178] sm:$0xff] %v679_v10 }
 0x12a LB: >> { %v2295_v18 = vmov 0.0   ;;  %s2647_s12 = sshll.u32 %s2291_s11, 3  ;;  %vm823_vm1 = vcmask 64512   ;;  %s734_s11 = sadd.s32 1, %s2291_s11   ;;  %s2291_s11 = sphi %s2640_s11, %s734_s11  }
 0x12b   : >> { %984 = vmatprep.mubr.f32.mxu0 %v2295_v18  ;;  %s736_s13 = sadd.s32 64, %s2647_s12  ;;  %s738_s14 = sshra.s32 %s2647_s12, 3 }
 0x12c   : >> { %s745_s15 = sshra.s32 %s736_s13, 3  ;;  %s2651_s6 = sshll.u32 %s738_s14, 4 }
 0x12d   : >> { %s1929_s16 = sshll.u32 %s745_s15, 4  ;;  %s742_s17 = scalar_lea.vmem [#allocation2], %s2651_s6 }
 0x12e   : >> { %s749_s23 = scalar_lea.vmem [#allocation2], %s1929_s16  ;;  %s737_s25 = sadd.s32 128, %s2647_s12 }
 0x12f   : >> { %s752_s26 = sshra.s32 %s737_s25, 3  ;;  %s1593_s9 = scalar_lea.vmem [#allocation3], %s2651_s6 }
 0x130   : >> { %v744_v19 = vld [vmem:[%s742_s17 + $0x8] sm:$0xff]  ;;  %v743_v29 = vld [vmem:[%s742_s17] sm:$0xff]  ;;  %s1930_s7 = sshll.u32 %s752_s26, 4  ;;  %p731_p11 = scmp.ge.s32.totalorder %s734_s11, 8  }
 0x131   : >> { %v750_v30 = vld [vmem:[%s749_s23] sm:$0xff]  ;;  %920 = vmatprep.subr.mxu0 %v744_v19  ;;  %v751_v31 = vld [vmem:[%s749_s23 + $0x8] sm:$0xff]  ;;  %s2910_s8 = scalar_lea.vmem [#allocation2], %s1930_s7  ;;  %vm1640_vm2 = vcmask (%p731_p11), 523264   ;;  %s1932_s13 = sshll.u32 (%p731_p11), %s2350_s22, 10 }
 0x132   : >> { %759 = vxpose.xlu0.b32.start.end [1/1] (short) %v750_v30, 128  ;;  %921 = vmatpush1.msra.mxu0 %v743_v29  ;;  %s1772_s14 = sshll.u32 (%p731_p11), %s2638_s10, 4  ;;  %s3400_s6 = scalar_lea.hbm (%p731_p11), %s3458_s5, %s1932_s13  ;;  %s3402_s14 = int_to_ptr.vmem [resolvable:$true] %s1772_s14 }
 0x133   : > { %s3412_s16 = scalar_lea.sflag (%p731_p11), [#allocation5], %s215_s30  ;;  %s2221_s17 = scalar_lea.vmem (%p731_p11), %s3402_s14, 1024 }
 0x134   : > { %p2222_p12 = scmp.ne.s32.totalorder (%p731_p11), %s3402_s14, %s2221_s17  ;;  %s2296_s23 = smov (%p731_p11), [#allocation4]  }
 0x135   : > { %s2225_s25 = sshll.u32 (%p731_p11), %s2296_s23, 4  ;;  %s2226_s25 = int_to_ptr.vmem [resolvable:$false] %s2225_s25 }
 0x136   : > { %p2223_p13 = pnand (%p731_p11), %p2222_p12, %p2367_p5  ;;  %s2227_s26 = scalar_lea.vmem (%p731_p11), %s2226_s25, 2048 }
 0x137   : > { %p2228_p1 = scmp.lt.s32.totalorder (%p731_p11), %s3402_s14, %s2226_s25  ;;  %p2229_p2 = scmp.lt.s32.totalorder (%p731_p11), %s2227_s26, %s2221_s17 }
 0x138   : > { %p2224_p0 = pneg (%p731_p11), %p2223_p13 }
 0x139   : > { %p2230_p3 = por (%p731_p11), %p2229_p2, %p2228_p1 }
 0x13b   : > { %p2231_p4 = pnand (%p731_p11), %p2230_p3, %p2224_p0 }
 0x16f   : >> { %791 = vxpose.xlu0.b32.start.end [1/1] (short) %v751_v31, 128 }
 0x1b2   : >> { %v775_v32 = vpop.trf.xlu0 }
 0x1b3   : >> { %1885 = vmatmul.mubr.msk.f32.vlgmr.msra.gmra.mrb[0].mxu0 %vm823_vm1, %v775_v32 }
 0x1b4   : >> { %990 = vmatprep.mubr.f32.mxu0 %v2295_v18 }
 0x1b6   : >> { %v776_v33 = vpop.trf.xlu0 }
 0x1b7   : >> { %1886 = vmatmul.mubr.msk.f32.gmra.mrb[2].mxu0 %vm823_vm1, %v776_v33 }
 0x1b8   : >> { %996 = vmatprep.mubr.f32.mxu0 %v2295_v18 }
 0x1ba   : >> { %v777_v34 = vpop.trf.xlu0 }
 0x1bb   : >> { %1887 = vmatmul.mubr.msk.f32.gmra.mrb[4].mxu0 %vm823_vm1, %v777_v34 }
 0x1bc   : >> { %1002 = vmatprep.mubr.f32.mxu0 %v2295_v18 }
 0x1be   : >> { %v778_v35 = vpop.trf.xlu0 }
 0x1bf   : >> { %1888 = vmatmul.mubr.msk.f32.gmra.mrb[6].mxu0 %vm823_vm1, %v778_v35 }
 0x1c0   : >> { %1008 = vmatprep.mubr.f32.mxu0 %v2295_v18 }
 0x1c2   : >> { %v779_v36 = vpop.trf.xlu0 }
 0x1c3   : >> { %1889 = vmatmul.mubr.msk.f32.gmra.mrb[8].mxu0 %vm823_vm1, %v779_v36 }
 0x1c4   : >> { %1014 = vmatprep.mubr.f32.mxu0 %v2295_v18 }
 0x1c6   : >> { %v780_v13 = vpop.trf.xlu0 }
 0x1c7   : >> { %1890 = vmatmul.mubr.msk.f32.gmra.mrb[10].mxu0 %vm823_vm1, %v780_v13 }
 0x1c8   : >> { %1020 = vmatprep.mubr.f32.mxu0 %v2295_v18 }
 0x1ca   : >> { %v781_v37 = vpop.trf.xlu0 }
 0x1cb   : >> { %1891 = vmatmul.mubr.msk.f32.gmra.mrb[12].mxu0 %vm823_vm1, %v781_v37 }
 0x1cc   : >> { %1026 = vmatprep.mubr.f32.mxu0 %v2295_v18 }
 0x1ce   : >> { %v782_v38 = vpop.trf.xlu0 }
 0x1cf   : >> { %1892 = vmatmul.mubr.msk.f32.gmra.mrb[14].mxu0 %vm823_vm1, %v782_v38 }
 0x1d0   : >> { %1032 = vmatprep.mubr.f32.mxu0 %v2295_v18 }
 0x1d2   : >> { %v783_v39 = vpop.trf.xlu0 }
 0x1d3   : >> { %1893 = vmatmul.mubr.msk.f32.gmra.mrb[16].mxu0 %vm823_vm1, %v783_v39 }
 0x1d4   : >> { %1038 = vmatprep.mubr.f32.mxu0 %v2295_v18 }
 0x1d6   : >> { %v784_v40 = vpop.trf.xlu0 }
 0x1d7   : >> { %1894 = vmatmul.mubr.msk.f32.gmra.mrb[18].mxu0 %vm823_vm1, %v784_v40 }
 0x1d8   : >> { %1044 = vmatprep.mubr.f32.mxu0 %v2295_v18 }
 0x1da   : >> { %v785_v41 = vpop.trf.xlu0 }
 0x1db   : >> { %1895 = vmatmul.mubr.msk.f32.gmra.mrb[20].mxu0 %vm823_vm1, %v785_v41 }
 0x1dc   : >> { %1050 = vmatprep.mubr.f32.mxu0 %v2295_v18 }
 0x1de   : >> { %v786_v42 = vpop.trf.xlu0 }
 0x1df   : >> { %1896 = vmatmul.mubr.msk.f32.gmra.mrb[22].mxu0 %vm823_vm1, %v786_v42 }
 0x1e0   : >> { %1056 = vmatprep.mubr.f32.mxu0 %v2295_v18 }
 0x1e2   : >> { %v787_v43 = vpop.trf.xlu0 }
 0x1e3   : >> { %1897 = vmatmul.mubr.msk.f32.gmra.mrb[24].mxu0 %vm823_vm1, %v787_v43 }
 0x1e4   : >> { %1062 = vmatprep.mubr.f32.mxu0 %v2295_v18 }
 0x1e6   : >> { %v788_v44 = vpop.trf.xlu0 }
 0x1e7   : >> { %1898 = vmatmul.mubr.msk.f32.gmra.mrb[26].mxu0 %vm823_vm1, %v788_v44 }
 0x1e8   : >> { %1068 = vmatprep.mubr.f32.mxu0 %v2295_v18 }
 0x1ea   : >> { %v789_v14 = vpop.trf.xlu0 }
 0x1eb   : >> { %1899 = vmatmul.mubr.msk.f32.gmra.mrb[28].mxu0 %vm823_vm1, %v789_v14 }
 0x1ec   : >> { %1074 = vmatprep.mubr.f32.mxu0 %v2295_v18 }
 0x1ee   : >> { %v790_v45 = vpop.trf.xlu0 }
 0x1ef   : >> { %1900 = vmatmul.mubr.msk.f32.gmra.mrb[30].mxu0 %vm823_vm1, %v790_v45 }
 0x1f0   : >> { %1080 = vmatprep.mubr.f32.mxu0 %v2295_v18 }
 0x1f2   : >> { %v807_v46 = vpop.trf.xlu0 }
 0x1f3   : >> { %1901 = vmatmul.mubr.msk.f32.gmra.mrb[32].mxu0 %vm823_vm1, %v807_v46 }
 0x1f4   : >> { %1086 = vmatprep.mubr.f32.mxu0 %v2295_v18 }
 0x1f6   : >> { %v808_v47 = vpop.trf.xlu0 }
 0x1f7   : >> { %1902 = vmatmul.mubr.msk.f32.gmra.mrb[34].mxu0 %vm823_vm1, %v808_v47 }
 0x1f8   : >> { %1092 = vmatprep.mubr.f32.mxu0 %v2295_v18 }
 0x1fa   : >> { %v809_v48 = vpop.trf.xlu0 }
 0x1fb   : >> { %1903 = vmatmul.mubr.msk.f32.gmra.mrb[36].mxu0 %vm823_vm1, %v809_v48 }
 0x1fc   : >> { %1098 = vmatprep.mubr.f32.mxu0 %v2295_v18 }
 0x1fe   : >> { %v810_v49 = vpop.trf.xlu0 }
 0x1ff   : >> { %1904 = vmatmul.mubr.msk.f32.gmra.mrb[38].mxu0 %vm823_vm1, %v810_v49 }
 0x200   : >> { %1104 = vmatprep.mubr.f32.mxu0 %v2295_v18 }
 0x202   : >> { %v811_v50 = vpop.trf.xlu0 }
 0x203   : >> { %1905 = vmatmul.mubr.msk.f32.gmra.mrb[40].mxu0 %vm823_vm1, %v811_v50 }
 0x204   : >> { %1110 = vmatprep.mubr.f32.mxu0 %v2295_v18 }
 0x206   : >> { %v812_v51 = vpop.trf.xlu0 }
 0x207   : >> { %1906 = vmatmul.mubr.msk.f32.gmra.mrb[42].mxu0 %vm823_vm1, %v812_v51 }
 0x208   : >> { %1116 = vmatprep.mubr.f32.mxu0 %v2295_v18 }
 0x20a   : >> { %v813_v52 = vpop.trf.xlu0 }
 0x20b   : >> { %1907 = vmatmul.mubr.msk.f32.gmra.mrb[44].mxu0 %vm823_vm1, %v813_v52 }
 0x20c   : >> { %1122 = vmatprep.mubr.f32.mxu0 %v2295_v18 }
 0x20e   : >> { %v814_v15 = vpop.trf.xlu0 }
 0x20f   : >> { %1908 = vmatmul.mubr.msk.f32.gmra.mrb[46].mxu0 %vm823_vm1, %v814_v15 }
 0x210   : >> { %1128 = vmatprep.mubr.f32.mxu0 %v2295_v18 }
 0x212   : >> { %v815_v53 = vpop.trf.xlu0 }
 0x213   : >> { %1909 = vmatmul.mubr.msk.f32.gmra.mrb[48].mxu0 %vm823_vm1, %v815_v53 }
 0x214   : >> { %1134 = vmatprep.mubr.f32.mxu0 %v2295_v18 }
 0x216   : >> { %v816_v54 = vpop.trf.xlu0 }
 0x217   : >> { %1910 = vmatmul.mubr.msk.f32.gmra.mrb[50].mxu0 %vm823_vm1, %v816_v54 }
 0x218   : >> { %1140 = vmatprep.mubr.f32.mxu0 %v2295_v18 }
 0x21a   : >> { %v817_v55 = vpop.trf.xlu0 }
 0x21b   : >> { %1911 = vmatmul.mubr.msk.f32.gmra.mrb[52].mxu0 %vm823_vm1, %v817_v55 }
 0x21c   : >> { %1146 = vmatprep.mubr.f32.mxu0 %v2295_v18 }
 0x21e   : >> { %v818_v56 = vpop.trf.xlu0 }
 0x21f   : >> { %1912 = vmatmul.mubr.msk.f32.gmra.mrb[54].mxu0 %vm823_vm1, %v818_v56 }
 0x220   : >> { %1152 = vmatprep.mubr.f32.mxu0 %v2295_v18 }
 0x222   : >> { %v819_v57 = vpop.trf.xlu0 }
 0x223   : >> { %1913 = vmatmul.mubr.msk.f32.gmra.mrb[56].mxu0 %vm823_vm1, %v819_v57 }
 0x224   : >> { %1158 = vmatprep.mubr.f32.mxu0 %v2295_v18 }
 0x226   : >> { %v820_v58 = vpop.trf.xlu0 }
 0x227   : >> { %1914 = vmatmul.mubr.msk.f32.gmra.mrb[58].mxu0 %vm823_vm1, %v820_v58 }
 0x228   : >> { %1164 = vmatprep.mubr.f32.mxu0 %v2295_v18 }
 0x22a   : >> { %v821_v59 = vpop.trf.xlu0 }
 0x22b   : >> { %1915 = vmatmul.mubr.msk.f32.gmra.mrb[60].mxu0 %vm823_vm1, %v821_v59 }
 0x22c   : >> { %1170 = vmatprep.mubr.f32.mxu0 %v2295_v18 }
 0x22e   : >> { %v822_v60 = vpop.trf.xlu0 }
 0x22f   : >> { %1916 = vmatmul.mubr.msk.f32.gmra.mrb[62].mxu0 %vm823_vm1, %v822_v60 }
 0x286   : >> { %v2717_v16 = vpop.f32.mrb[0].mxu0 }
 0x287   : >> { %v2719_v61 = vpop.f32.mrb[1].mxu0 }
 0x28a   : >> { %v2721_v62 = vpop.f32.mrb[2].mxu0 }
 0x28b   : >> { %v2723_v63 = vpop.f32.mrb[3].mxu0 }
 0x28e   : >> { %v2725_v5 = vpop.f32.mrb[4].mxu0 }
 0x28f   : >> { %v1177_v20 = vmax.f32 %v2717_v16, %v2725_v5  ;;  %v2729_v9 = vpop.f32.mrb[5].mxu0 }
 0x290   : >> { %v1214_v21 = vmax.f32 %v2719_v61, %v2729_v9 }
 0x292   : >> { %v2733_v22 = vpop.f32.mrb[6].mxu0 }
 0x293   : >> { %v1178_v17 = vmax.f32 %v2721_v62, %v2733_v22  ;;  %v2737_v23 = vpop.f32.mrb[7].mxu0 }
 0x294   : >> { %v1215_v24 = vmax.f32 %v2723_v63, %v2737_v23 }
 0x296   : >> { %v2741_v25 = vpop.f32.mrb[8].mxu0 }
 0x297   : >> { %v1179_v26 = vmax.f32 %v1177_v20, %v2741_v25  ;;  %v2744_v27 = vpop.f32.mrb[9].mxu0 }
 0x298   : >> { %v1216_v28 = vmax.f32 %v1214_v21, %v2744_v27 }
 0x29a   : >> { %v2747_v10 = vpop.f32.mrb[10].mxu0 }
 0x29b   : >> { %v1180_v18 = vmax.f32 %v1178_v17, %v2747_v10  ;;  %v2750_v19 = vpop.f32.mrb[11].mxu0 }
 0x29c   : >> { %v1217_v29 = vmax.f32 %v1215_v24, %v2750_v19 }
 0x29e   : >> { %v2753_v30 = vpop.f32.mrb[12].mxu0 }
 0x29f   : >> { %v1181_v31 = vmax.f32 %v1179_v26, %v2753_v30  ;;  %v2756_v32 = vpop.f32.mrb[13].mxu0 }
 0x2a0   : >> { %v1218_v33 = vmax.f32 %v1216_v28, %v2756_v32 }
 0x2a2   : >> { %v2759_v34 = vpop.f32.mrb[14].mxu0 }
 0x2a3   : >> { %v1182_v35 = vmax.f32 %v1180_v18, %v2759_v34  ;;  %v2762_v36 = vpop.f32.mrb[15].mxu0 }
 0x2a4   : >> { %v1219_v13 = vmax.f32 %v1217_v29, %v2762_v36 }
 0x2a6   : >> { %v2765_v37 = vpop.f32.mrb[16].mxu0 }
 0x2a7   : >> { %v1183_v38 = vmax.f32 %v1181_v31, %v2765_v37  ;;  %v2768_v39 = vpop.f32.mrb[17].mxu0 }
 0x2a8   : >> { %v1220_v40 = vmax.f32 %v1218_v33, %v2768_v39 }
 0x2aa   : >> { %v2771_v41 = vpop.f32.mrb[18].mxu0 }
 0x2ab   : >> { %v1184_v42 = vmax.f32 %v1182_v35, %v2771_v41  ;;  %v2774_v43 = vpop.f32.mrb[19].mxu0 }
 0x2ac   : >> { %v1221_v44 = vmax.f32 %v1219_v13, %v2774_v43 }
 0x2ae   : >> { %v2777_v14 = vpop.f32.mrb[20].mxu0 }
 0x2af   : >> { %v1185_v45 = vmax.f32 %v1183_v38, %v2777_v14  ;;  %v2780_v46 = vpop.f32.mrb[21].mxu0 }
 0x2b0   : >> { %v1222_v47 = vmax.f32 %v1220_v40, %v2780_v46 }
 0x2b2   : >> { %v2783_v48 = vpop.f32.mrb[22].mxu0 }
 0x2b3   : >> { %v1186_v49 = vmax.f32 %v1184_v42, %v2783_v48  ;;  %v2786_v50 = vpop.f32.mrb[23].mxu0 }
 0x2b4   : >> { %v1223_v51 = vmax.f32 %v1221_v44, %v2786_v50 }
 0x2b6   : >> { %v2789_v52 = vpop.f32.mrb[24].mxu0 }
 0x2b7   : >> { %v1187_v15 = vmax.f32 %v1185_v45, %v2789_v52  ;;  %v2792_v53 = vpop.f32.mrb[25].mxu0 }
 0x2b8   : >> { %v1224_v54 = vmax.f32 %v1222_v47, %v2792_v53 }
 0x2ba   : >> { %v2795_v55 = vpop.f32.mrb[26].mxu0 }
 0x2bb   : >> { %v1188_v56 = vmax.f32 %v1186_v49, %v2795_v55  ;;  %v2798_v57 = vpop.f32.mrb[27].mxu0 }
 0x2bc   : >> { %v1225_v58 = vmax.f32 %v1223_v51, %v2798_v57 }
 0x2be   : >> { %v2801_v59 = vpop.f32.mrb[28].mxu0 }
 0x2bf   : >> { %v1189_v60 = vmax.f32 %v1187_v15, %v2801_v59  ;;  %v2804_v20 = vpop.f32.mrb[29].mxu0 }
 0x2c0   : >> { %3517 = vst [vmem:[#allocation15_spill] sm:$0xff] %v2804_v20  ;;  %v1226_v21 = vmax.f32 %v1224_v54, %v2804_v20 }
 0x2c2   : >> { %v2807_v17 = vpop.f32.mrb[30].mxu0 }
 0x2c3   : >> { %v1190_v24 = vmax.f32 %v1188_v56, %v2807_v17  ;;  %v2810_v26 = vpop.f32.mrb[31].mxu0 }
 0x2c4   : >> { %3518 = vst [vmem:[#allocation16_spill] sm:$0xff] %v2810_v26  ;;  %v1227_v28 = vmax.f32 %v1225_v58, %v2810_v26 }
 0x2c6   : >> { %v2813_v18 = vpop.f32.mrb[32].mxu0 }
 0x2c7   : >> { %v1191_v29 = vmax.f32 %v1189_v60, %v2813_v18  ;;  %v2816_v31 = vpop.f32.mrb[33].mxu0 }
 0x2c8   : >> { %3519 = vst [vmem:[#allocation17_spill] sm:$0xff] %v2816_v31  ;;  %v1228_v33 = vmax.f32 %v1226_v21, %v2816_v31 }
 0x2ca   : >> { %v2819_v35 = vpop.f32.mrb[34].mxu0 }
 0x2cb   : >> { %v1192_v13 = vmax.f32 %v1190_v24, %v2819_v35  ;;  %v2822_v38 = vpop.f32.mrb[35].mxu0 }
 0x2cc   : >> { %3520 = vst [vmem:[#allocation18_spill] sm:$0xff] %v2822_v38  ;;  %v1229_v40 = vmax.f32 %v1227_v28, %v2822_v38 }
 0x2ce   : >> { %v2825_v42 = vpop.f32.mrb[36].mxu0 }
 0x2cf   : >> { %v1193_v44 = vmax.f32 %v1191_v29, %v2825_v42  ;;  %v2828_v45 = vpop.f32.mrb[37].mxu0 }
 0x2d0   : >> { %3521 = vst [vmem:[#allocation19_spill] sm:$0xff] %v2828_v45  ;;  %v1230_v47 = vmax.f32 %v1228_v33, %v2828_v45 }
 0x2d2   : >> { %v2831_v49 = vpop.f32.mrb[38].mxu0 }
 0x2d3   : >> { %v1194_v51 = vmax.f32 %v1192_v13, %v2831_v49  ;;  %v2834_v15 = vpop.f32.mrb[39].mxu0 }
 0x2d4   : >> { %3522 = vst [vmem:[#allocation20_spill] sm:$0xff] %v2834_v15  ;;  %v1231_v54 = vmax.f32 %v1229_v40, %v2834_v15 }
 0x2d6   : >> { %v2837_v56 = vpop.f32.mrb[40].mxu0 }
 0x2d7   : >> { %v1195_v58 = vmax.f32 %v1193_v44, %v2837_v56  ;;  %v2840_v60 = vpop.f32.mrb[41].mxu0 }
 0x2d8   : >> { %3523 = vst [vmem:[#allocation21_spill] sm:$0xff] %v2840_v60  ;;  %v1232_v21 = vmax.f32 %v1230_v47, %v2840_v60 }
 0x2da   : >> { %v2843_v24 = vpop.f32.mrb[42].mxu0 }
 0x2db   : >> { %v1196_v28 = vmax.f32 %v1194_v51, %v2843_v24  ;;  %v2846_v29 = vpop.f32.mrb[43].mxu0 }
 0x2dc   : >> { %3524 = vst [vmem:[#allocation22_spill] sm:$0xff] %v2846_v29  ;;  %v1233_v33 = vmax.f32 %v1231_v54, %v2846_v29 }
 0x2de   : >> { %v2849_v13 = vpop.f32.mrb[44].mxu0 }
 0x2df   : >> { %v1197_v40 = vmax.f32 %v1195_v58, %v2849_v13  ;;  %v2852_v1 = vpop.f32.mrb[45].mxu0 }
 0x2e0   : >> { %3525 = vst [vmem:[#allocation23_spill] sm:$0xff] %v2852_v1  ;;  %v1234_v44 = vmax.f32 %v1232_v21, %v2852_v1 }
 0x2e2   : >> { %v2855_v0 = vpop.f32.mrb[46].mxu0 }
 0x2e3   : >> { %v1198_v47 = vmax.f32 %v1196_v28, %v2855_v0  ;;  %v2858_v8 = vpop.f32.mrb[47].mxu0 }
 0x2e4   : >> { %3526 = vst [vmem:[#allocation24_spill] sm:$0xff] %v2858_v8  ;;  %v1235_v51 = vmax.f32 %v1233_v33, %v2858_v8 }
 0x2e6   : >> { %v2861_v3 = vpop.f32.mrb[48].mxu0 }
 0x2e7   : >> { %v1199_v54 = vmax.f32 %v1197_v40, %v2861_v3  ;;  %v2864_v12 = vpop.f32.mrb[49].mxu0 }
 0x2e8   : >> { %3527 = vst [vmem:[#allocation25_spill] sm:$0xff] %v2864_v12  ;;  %v1236_v58 = vmax.f32 %v1234_v44, %v2864_v12 }
 0x2ea   : >> { %v2867_v6 = vpop.f32.mrb[50].mxu0 }
 0x2eb   : >> { %v1200_v21 = vmax.f32 %v1198_v47, %v2867_v6  ;;  %v2870_v7 = vpop.f32.mrb[51].mxu0 }
 0x2ec   : >> { %3528 = vst [vmem:[#allocation26_spill] sm:$0xff] %v2870_v7  ;;  %v1237_v28 = vmax.f32 %v1235_v51, %v2870_v7 }
 0x2ee   : >> { %v2873_v2 = vpop.f32.mrb[52].mxu0 }
 0x2ef   : >> { %v1201_v33 = vmax.f32 %v1199_v54, %v2873_v2  ;;  %v2876_v11 = vpop.f32.mrb[53].mxu0 }
 0x2f0   : >> { %3529 = vst [vmem:[#allocation27_spill] sm:$0xff] %v2876_v11  ;;  %v1238_v40 = vmax.f32 %v1236_v58, %v2876_v11 }
 0x2f2   : >> { %v2879_v4 = vpop.f32.mrb[54].mxu0 }
 0x2f3   : >> { %v1202_v44 = vmax.f32 %v1200_v21, %v2879_v4  ;;  %v2882_v12 = vpop.f32.mrb[55].mxu0 }
 0x2f4   : >> { %3530 = vst [vmem:[#allocation28_spill] sm:$0xff] %v2882_v12  ;;  %v1239_v47 = vmax.f32 %v1237_v28, %v2882_v12 }
 0x2f6   : >> { %v2885_v8 = vpop.f32.mrb[56].mxu0 }
 0x2f7   : >> { %v1203_v51 = vmax.f32 %v1201_v33, %v2885_v8  ;;  %v2888_v7 = vpop.f32.mrb[57].mxu0 }
 0x2f8   : >> { %3531 = vst [vmem:[#allocation29_spill] sm:$0xff] %v2888_v7  ;;  %v1240_v54 = vmax.f32 %v1238_v40, %v2888_v7 }
 0x2fa   : >> { %v2891_v1 = vpop.f32.mrb[58].mxu0 }
 0x2fb   : >> { %v1204_v58 = vmax.f32 %v1202_v44, %v2891_v1  ;;  %v2894_v11 = vpop.f32.mrb[59].mxu0 }
 0x2fc   : >> { %3532 = vst [vmem:[#allocation30_spill] sm:$0xff] %v2894_v11  ;;  %v1241_v21 = vmax.f32 %v1239_v47, %v2894_v11 }
 0x2fe   : >> { %v2897_v29 = vpop.f32.mrb[60].mxu0 }
 0x2ff   : >> { %v1205_v28 = vmax.f32 %v1203_v51, %v2897_v29  ;;  %v2900_v12 = vpop.f32.mrb[61].mxu0 }
 0x300   : >> { %3533 = vst [vmem:[#allocation31_spill] sm:$0xff] %v2900_v12  ;;  %v1242_v33 = vmax.f32 %v1240_v54, %v2900_v12 }
 0x302   : >> { %v2903_v60 = vpop.f32.mrb[62].mxu0 }
 0x303   : >> { %v1206_v40 = vmax.f32 %v1204_v58, %v2903_v60  ;;  %v2906_v7 = vpop.f32.mrb[63].mxu0  ;;  %v758_v58 = vld [vmem:[%s2910_s8 + $0x8] sm:$0xff] }
 0x304   : >> { %3534 = vst [vmem:[#allocation32_spill] sm:$0xff] %v2906_v7  ;;  %v1243_v44 = vmax.f32 %v1241_v21, %v2906_v7  ;;  %1583 = vmatprep.mubr.f32.mxu1 %v758_v58 }
 0x305   : >> { %v1207_v15 = vmax.f32 %v1205_v28, %v1206_v40 }
 0x306   : >> { %v1244_v45 = vmax.f32 %v1242_v33, %v1243_v44 }
 0x307   : >> { %v1208_v38 = vrot.slane %v1207_v15, 4 }
 0x308   : >> { %v1245_v47 = vrot.slane %v1244_v45, 4 }
 0x309   : >> { %v1209_v11 = vmax.f32 %v1207_v15, %v1208_v38 }
 0x30a   : >> { %v1246_v31 = vmax.f32 %v1244_v45, %v1245_v47 }
 0x30b   : >> { %v1210_v51 = vrot.slane %v1209_v11, 2 }
 0x30c   : >> { %v1247_v26 = vrot.slane %v1246_v31, 2 }
 0x30d   : >> { %v1211_v54 = vmax.f32 %v1209_v11, %v1210_v51 }
 0x30e   : >> { %v1248_v12 = vmax.f32 %v1246_v31, %v1247_v26  ;;  %v3551_v31 = vld [vmem:[#allocation31_spill] sm:$0xff] }
 0x30f   : >> { %v1212_v20 = vrot.slane %v1211_v54, 1 }
 0x310   : >> { %v1249_v21 = vrot.slane %v1248_v12, 1 }
 0x311   : >> { %v2913_v28 = vmax.f32 %v1211_v54, %v1212_v20 }
 0x312   : >> { %v2915_v33 = vmax.f32 %v1248_v12, %v1249_v21 }
 0x313   : >> { %v1251_v38 = vsub.f32 %v2717_v16, %v2913_v28  ;;  %v1253_v45 = vsub.f32 %v2721_v62, %v2913_v28  ;;  %v1255_v11 = vsub.f32 %v2725_v5, %v2913_v28  ;;  %v1257_v15 = vsub.f32 %v2733_v22, %v2913_v28 }
 0x314   : >> { %v1259_v26 = vsub.f32 %v2741_v25, %v2913_v28  ;;  %v1261_v20 = vsub.f32 %v2747_v10, %v2913_v28  ;;  %v1263_v12 = vsub.f32 %v2753_v30, %v2913_v28  ;;  %v1265_v16 = vsub.f32 %v2759_v34, %v2913_v28 }
 0x315   : >> { %v1267_v62 = vsub.f32 %v2765_v37, %v2913_v28  ;;  %v1269_v5 = vsub.f32 %v2771_v41, %v2913_v28  ;;  %v1271_v22 = vsub.f32 %v2777_v14, %v2913_v28  ;;  %v1273_v25 = vsub.f32 %v2783_v48, %v2913_v28 }
 0x316   : >> { %v1275_v10 = vsub.f32 %v2789_v52, %v2913_v28  ;;  %v1277_v30 = vsub.f32 %v2795_v55, %v2913_v28  ;;  %v1279_v34 = vsub.f32 %v2801_v59, %v2913_v28  ;;  %v1281_v37 = vsub.f32 %v2807_v17, %v2913_v28 }
 0x317   : >> { %v1283_v41 = vsub.f32 %v2813_v18, %v2913_v28  ;;  %v1285_v14 = vsub.f32 %v2819_v35, %v2913_v28  ;;  %v1287_v48 = vsub.f32 %v2825_v42, %v2913_v28  ;;  %v1289_v52 = vsub.f32 %v2831_v49, %v2913_v28 }
 0x318   : >> { %v1291_v55 = vsub.f32 %v2837_v56, %v2913_v28  ;;  %v1293_v59 = vsub.f32 %v2843_v24, %v2913_v28  ;;  %v1295_v17 = vsub.f32 %v2849_v13, %v2913_v28  ;;  %v1297_v18 = vsub.f32 %v2855_v0, %v2913_v28 }
 0x319   : >> { %v1315_v40 = vmul.f32 1.442695, %v1251_v38  ;;  %v1319_v44 = vmul.f32 1.442695, %v1253_v45  ;;  %v1323_v47 = vmul.f32 1.442695, %v1255_v11 }
 0x31a   : >> { %v1327_v54 = vmul.f32 1.442695, %v1257_v15  ;;  %v1331_v21 = vmul.f32 1.442695, %v1259_v26  ;;  %v1335_v24 = vmul.f32 1.442695, %v1261_v20 }
 0x31b   : >> { %2087 = vpow2.f32 %v1315_v40  ;;  %v1339_v56 = vmul.f32 1.442695, %v1263_v12  ;;  %v1343_v0 = vmul.f32 1.442695, %v1265_v16  ;;  %v1347_v49 = vmul.f32 1.442695, %v1267_v62 }
 0x31c   : >> { %2089 = vpow2.f32 %v1319_v44  ;;  %v1351_v13 = vmul.f32 1.442695, %v1269_v5  ;;  %v1355_v38 = vmul.f32 1.442695, %v1271_v22  ;;  %v1359_v45 = vmul.f32 1.442695, %v1273_v25 }
 0x31d   : >> { %2091 = vpow2.f32 %v1323_v47  ;;  %v1363_v11 = vmul.f32 1.442695, %v1275_v10  ;;  %v1367_v51 = vmul.f32 1.442695, %v1277_v30  ;;  %v1371_v15 = vmul.f32 1.442695, %v1279_v34 }
 0x31e   : >> { %2093 = vpow2.f32 %v1327_v54  ;;  %v1375_v42 = vmul.f32 1.442695, %v1281_v37  ;;  %v1379_v58 = vmul.f32 1.442695, %v1283_v41  ;;  %v1383_v40 = vmul.f32 1.442695, %v1285_v14 }
 0x31f   : >> { %2095 = vpow2.f32 %v1331_v21  ;;  %v1387_v26 = vmul.f32 1.442695, %v1287_v48  ;;  %v1391_v20 = vmul.f32 1.442695, %v1289_v52  ;;  %v1395_v44 = vmul.f32 1.442695, %v1291_v55 }
 0x320   : >> { %2097 = vpow2.f32 %v1335_v24  ;;  %v2985_v12 = vmul.f32 1.442695, %v1293_v59  ;;  %v2987_v16 = vmul.f32 1.442695, %v1295_v17  ;;  %v2989_v62 = vmul.f32 1.442695, %v1297_v18 }
 0x321   : >> { %2099 = vpow2.f32 %v1339_v56  ;;  %v3535_v24 = vld [vmem:[#allocation15_spill] sm:$0xff]  ;;  %v3537_v54 = vld [vmem:[#allocation17_spill] sm:$0xff]  ;;  %v3542_v48 = vld [vmem:[#allocation22_spill] sm:$0xff] }
 0x322   : >> { %2101 = vpow2.f32 %v1343_v0  ;;  %v3539_v18 = vld [vmem:[#allocation19_spill] sm:$0xff]  ;;  %v3540_v0 = vld [vmem:[#allocation20_spill] sm:$0xff]  ;;  %v3541_v52 = vld [vmem:[#allocation21_spill] sm:$0xff] }
 0x323   : >> { %2103 = vpow2.f32 %v1347_v49  ;;  %v3543_v49 = vld [vmem:[#allocation23_spill] sm:$0xff]  ;;  %v3544_v37 = vld [vmem:[#allocation24_spill] sm:$0xff]  ;;  %v3545_v47 = vld [vmem:[#allocation25_spill] sm:$0xff] }
 0x324   : >> { %2105 = vpow2.f32 %v1351_v13  ;;  %v3536_v13 = vld [vmem:[#allocation16_spill] sm:$0xff]  ;;  %v3546_v10 = vld [vmem:[#allocation26_spill] sm:$0xff] }
 0x325   : >> { %v2999_v30 = vpop.eup %2087  ;;  %2107 = vpow2.f32 %v1355_v38  ;;  %v3550_v21 = vld [vmem:[#allocation30_spill] sm:$0xff] }
 0x326   : >> { %v3007_v14 = vpop.eup %2089  ;;  %2109 = vpow2.f32 %v1359_v45 }
 0x327   : >> { %v3015_v59 = vpop.eup %2091  ;;  %2111 = vpow2.f32 %v1363_v11  ;;  %v1443_v17 = vadd.f32 %v3007_v14, %v2999_v30  ;;  %v3538_v11 = vld [vmem:[#allocation18_spill] sm:$0xff] }
 0x328   : >> { %v3023_v56 = vpop.eup %2093  ;;  %2113 = vpow2.f32 %v1367_v51  ;;  %v3548_v51 = vld [vmem:[#allocation28_spill] sm:$0xff] }
 0x329   : >> { %v3031_v38 = vpop.eup %2095  ;;  %2115 = vpow2.f32 %v1371_v15  ;;  %v1444_v45 = vadd.f32 %v3015_v59, %v1443_v17 }
 0x32a   : >> { %v3038_v55 = vpop.eup %2097  ;;  %2117 = vpow2.f32 %v1375_v42 }
 0x32b   : >> { %v3046_v41 = vpop.eup %2099  ;;  %2119 = vpow2.f32 %v1379_v58  ;;  %v1445_v17 = vadd.f32 %v3023_v56, %v1444_v45 }
 0x32c   : >> { %v3053_v34 = vpop.eup %2101  ;;  %2121 = vpow2.f32 %v1383_v40 }
 0x32d   : >> { %v3061_v22 = vpop.eup %2103  ;;  %2123 = vpow2.f32 %v1387_v26  ;;  %v1446_v45 = vadd.f32 %v3031_v38, %v1445_v17  ;;  %v3552_v17 = vsub.f32 %v2861_v3, %v2913_v28 }
 0x32e   : >> { %v3068_v35 = vpop.eup %2105  ;;  %2125 = vpow2.f32 %v1391_v20  ;;  %v3553_v20 = vsub.f32 %v2867_v6, %v2913_v28 }
 0x32f   : >> { %v3076_v25 = vpop.eup %2107  ;;  %2127 = vpow2.f32 %v1395_v44  ;;  %v1411_v42 = vmul.f32 1.442695, %v3552_v17  ;;  %v1447_v40 = vadd.f32 %v3038_v55, %v1446_v45  ;;  %v3554_v44 = vsub.f32 %v2873_v2, %v2913_v28 }
 0x330   : >> { %v3082_v5 = vpop.eup %2109  ;;  %2129 = vpow2.f32 %v2985_v12  ;;  %v1415_v58 = vmul.f32 1.442695, %v3553_v20  ;;  %v3555_v12 = vsub.f32 %v2879_v4, %v2913_v28  ;;  %v3559_v4 = vsub.f32 %v2897_v29, %v2913_v28 }
 0x331   : >> { %v3088_v15 = vpop.eup %2111  ;;  %2131 = vpow2.f32 %v2987_v16  ;;  %v1419_v26 = vmul.f32 1.442695, %v3554_v44  ;;  %v1448_v3 = vadd.f32 %v3046_v41, %v1447_v40  ;;  %v3556_v16 = vsub.f32 %v2885_v8, %v2913_v28 }
 0x332   : >> { %v3095_v17 = vpop.eup %2113  ;;  %2133 = vpow2.f32 %v2989_v62  ;;  %v1423_v45 = vmul.f32 1.442695, %v3555_v12  ;;  %v3557_v40 = vsub.f32 %v2891_v1, %v2913_v28 }
 0x333   : >> { %v3101_v6 = vpop.eup %2115  ;;  %2135 = vpow2.f32 %v1411_v42  ;;  %v1427_v20 = vmul.f32 1.442695, %v3556_v16  ;;  %v1449_v2 = vadd.f32 %v3053_v34, %v1448_v3  ;;  %v1435_v42 = vmul.f32 1.442695, %v3559_v4 }
 0x334   : >> { %v3107_v44 = vpop.eup %2117  ;;  %2137 = vpow2.f32 %v1415_v58  ;;  %v1431_v62 = vmul.f32 1.442695, %v3557_v40  ;;  %v3560_v3 = vsub.f32 %v2903_v60, %v2913_v28  ;;  %v3563_v60 = vsub.f32 %v2729_v9, %v2915_v33 }
 0x335   : >> { %v3112_v7 = vpop.eup %2119  ;;  %2139 = vpow2.f32 %v1419_v26  ;;  %v1450_v12 = vadd.f32 %v3061_v22, %v1449_v2  ;;  %v3561_v26 = vsub.f32 %v2719_v61, %v2915_v33  ;;  %v3562_v2 = vsub.f32 %v2723_v63, %v2915_v33 }
 0x336   : >> { %3558 = vst [vmem:[#allocation15_spill] sm:$0xff] %v3112_v7  ;;  %v3118_v8 = vpop.eup %2121  ;;  %2141 = vpow2.f32 %v1423_v45  ;;  %v1439_v58 = vmul.f32 1.442695, %v3560_v3  ;;  %v1325_v28 = vmul.f32 1.442695, %v3563_v60  ;;  %v3564_v61 = vsub.f32 %v2737_v23, %v2915_v33 }
 0x337   : >> { %v3123_v16 = vpop.eup %2123  ;;  %2143 = vpow2.f32 %v1427_v20  ;;  %v1451_v1 = vadd.f32 %v3068_v35, %v1450_v12  ;;  %v1317_v40 = vmul.f32 1.442695, %v3561_v26  ;;  %v1321_v45 = vmul.f32 1.442695, %v3562_v2 }
 0x338   : >> { %v3129_v29 = vpop.eup %2125  ;;  %2145 = vpow2.f32 %v1431_v62  ;;  %v1329_v12 = vmul.f32 1.442695, %v3564_v61  ;;  %v3565_v62 = vsub.f32 %v2744_v27, %v2915_v33  ;;  %v3566_v63 = vsub.f32 %v2750_v19, %v2915_v33 }
 0x339   : >> { %v3137_v4 = vpop.eup %2127  ;;  %2147 = vpow2.f32 %v1435_v42  ;;  %v1452_v20 = vadd.f32 %v3076_v25, %v1451_v1  ;;  %v3567_v42 = vsub.f32 %v2756_v32, %v2915_v33  ;;  %v3568_v1 = vsub.f32 %v2762_v36, %v2915_v33 }
 0x33a   : >> { %v1333_v3 = vmul.f32 1.442695, %v3565_v62  ;;  %v3146_v26 = vpop.eup %2129  ;;  %2149 = vpow2.f32 %v1439_v58  ;;  %v1337_v9 = vmul.f32 1.442695, %v3566_v63  ;;  %v3569_v58 = vsub.f32 %v2768_v39, %v2915_v33 }
 0x33b   : >> { %v1341_v2 = vmul.f32 1.442695, %v3567_v42  ;;  %v1345_v23 = vmul.f32 1.442695, %v3568_v1  ;;  %v3157_v60 = vpop.eup %2131  ;;  %v1453_v27 = vadd.f32 %v3082_v5, %v1452_v20  ;;  %2151 = vpow2.f32 %v1317_v40 }
 0x33c   : >> { %v1349_v61 = vmul.f32 1.442695, %v3569_v58  ;;  %v3570_v19 = vsub.f32 %v2774_v43, %v2915_v33  ;;  %v3166_v63 = vpop.eup %2133  ;;  %2153 = vpow2.f32 %v1321_v45 }
 0x33d   : >> { %v3174_v20 = vpop.eup %2135  ;;  %v1454_v39 = vadd.f32 %v3088_v15, %v1453_v27  ;;  %2155 = vpow2.f32 %v1325_v28 }
 0x33e   : >> { %v1353_v62 = vmul.f32 1.442695, %v3570_v19  ;;  %v3181_v42 = vpop.eup %2137  ;;  %2157 = vpow2.f32 %v1329_v12  ;;  %v3571_v12 = vsub.f32 %v2780_v46, %v2915_v33  ;;  %v3572_v19 = vsub.f32 %v2786_v50, %v2915_v33 }
 0x33f   : >> { %v3189_v27 = vpop.eup %2139  ;;  %v1455_v28 = vadd.f32 %v3095_v17, %v1454_v39  ;;  %2159 = vpow2.f32 %v1333_v3 }
 0x340   : >> { %v3196_v43 = vpop.eup %2141  ;;  %2161 = vpow2.f32 %v1337_v9  ;;  %v1357_v45 = vmul.f32 1.442695, %v3571_v12  ;;  %v1361_v58 = vmul.f32 1.442695, %v3572_v19 }
 0x341   : >> { %v3204_v39 = vpop.eup %2143  ;;  %v1456_v3 = vadd.f32 %v3101_v6, %v1455_v28  ;;  %2163 = vpow2.f32 %v1341_v2  ;;  %v3573_v2 = vsub.f32 %v2792_v53, %v2915_v33  ;;  %v3578_v53 = vsub.f32 %v3538_v11, %v2915_v33 }
 0x342   : >> { %v3212_v40 = vpop.eup %2145  ;;  %2165 = vpow2.f32 %v1345_v23  ;;  %v3574_v23 = vsub.f32 %v2798_v57, %v2915_v33  ;;  %v3577_v57 = vsub.f32 %v3537_v54, %v2915_v33  ;;  %v3581_v11 = vsub.f32 %v3541_v52, %v2915_v33 }
 0x343   : >> { %v3217_v1 = vpop.eup %2147  ;;  %v1457_v36 = vadd.f32 %v3107_v44, %v1456_v3  ;;  %2167 = vpow2.f32 %v1349_v61  ;;  %v1365_v46 = vmul.f32 1.442695, %v3573_v2  ;;  %v3575_v61 = vsub.f32 %v3535_v24, %v2915_v33 }
 0x344   : >> { %v3225_v12 = vpop.eup %2149  ;;  %2169 = vpow2.f32 %v1353_v62  ;;  %v1369_v50 = vmul.f32 1.442695, %v3574_v23  ;;  %v3576_v62 = vsub.f32 %v3536_v13, %v2915_v33  ;;  %v1381_v23 = vmul.f32 1.442695, %v3577_v57 }
 0x345   : >> { %v2152_v19 = vpop.eup %2151  ;;  %v1458_v9 = vadd.f32 %v3112_v7, %v1457_v36  ;;  %2171 = vpow2.f32 %v1357_v45  ;;  %v1373_v3 = vmul.f32 1.442695, %v3575_v61  ;;  %v3579_v13 = vsub.f32 %v3539_v18, %v2915_v33 }
 0x346   : >> { %v2154_v2 = vpop.eup %2153  ;;  %2173 = vpow2.f32 %v1361_v58  ;;  %v1377_v28 = vmul.f32 1.442695, %v3576_v62  ;;  %v1385_v58 = vmul.f32 1.442695, %v3578_v53  ;;  %v1397_v53 = vmul.f32 1.442695, %v3581_v11 }
 0x347   : >> { %v2156_v32 = vpop.eup %2155  ;;  %v1459_v36 = vadd.f32 %v3118_v8, %v1458_v9  ;;  %2175 = vpow2.f32 %v1365_v46  ;;  %v1480_v45 = vadd.f32 %v2154_v2, %v2152_v19  ;;  %v1941_v24 = vpack.c.bf16 %v2154_v2, %v2152_v19 }
 0x348   : >> { %v2158_v61 = vpop.eup %2157  ;;  %2177 = vpow2.f32 %v1369_v50  ;;  %v1389_v62 = vmul.f32 1.442695, %v3579_v13  ;;  %v3580_v50 = vsub.f32 %v3540_v0, %v2915_v33  ;;  %v3582_v18 = vpack.c.bf16 %v3007_v14, %v2999_v30 }
 0x349   : >> { %v2160_v7 = vpop.eup %2159  ;;  %v1460_v54 = vadd.f32 %v3123_v16, %v1459_v36  ;;  %2179 = vpow2.f32 %v1373_v3  ;;  %v1481_v57 = vadd.f32 %v2156_v32, %v1480_v45  ;;  %1942 = vmatprep.subr.bf16.mxu1 %v1941_v24  ;;  %v1945_v9 = vpack.c.bf16 %v2158_v61, %v2156_v32 }
 0x34a   : >> { %v2162_v46 = vpop.eup %2161  ;;  %2181 = vpow2.f32 %v1377_v28  ;;  %v1393_v19 = vmul.f32 1.442695, %v3580_v50  ;;  %1944 = vmatpush1.bf16.msra.mxu1 %v3582_v18  ;;  %v3583_v0 = vsub.f32 %v3542_v48, %v2915_v33  ;;  %v3584_v52 = vsub.f32 %v3543_v49, %v2915_v33  ;;  %v3589_v18 = vld [vmem:[#allocation27_spill] sm:$0xff] }
 0x34b   : >> { %v2164_v2 = vpop.eup %2163  ;;  %v1461_v3 = vadd.f32 %v3129_v29, %v1460_v54  ;;  %2183 = vpow2.f32 %v1381_v23  ;;  %v1482_v36 = vadd.f32 %v2158_v61, %v1481_v57  ;;  %1946 = vmatprep.subr.bf16.mxu1 %v1945_v9  ;;  %v1949_v32 = vpack.c.bf16 %v2162_v46, %v2160_v7 }
 0x34c   : >> { %v2166_v28 = vpop.eup %2165  ;;  %2185 = vpow2.f32 %v1385_v58  ;;  %v1401_v45 = vmul.f32 1.442695, %v3583_v0  ;;  %v1405_v24 = vmul.f32 1.442695, %v3584_v52  ;;  %v3585_v61 = vsub.f32 %v3544_v37, %v2915_v33 }
 0x34d   : >> { %v2168_v13 = vpop.eup %2167  ;;  %v1462_v30 = vadd.f32 %v3137_v4, %v1461_v3  ;;  %2187 = vpow2.f32 %v1389_v62  ;;  %v1483_v14 = vadd.f32 %v2160_v7, %v1482_v36  ;;  %v1953_v54 = vpack.c.bf16 %v2166_v28, %v2164_v2 }
 0x34e   : >> { %v2170_v23 = vpop.eup %2169  ;;  %2189 = vpow2.f32 %v1393_v19  ;;  %v1409_v58 = vmul.f32 1.442695, %v3585_v61  ;;  %v3586_v48 = vsub.f32 %v3545_v47, %v2915_v33  ;;  %v3587_v49 = vpack.c.bf16 %v3023_v56, %v3015_v59 }
 0x34f   : >> { %v2172_v9 = vpop.eup %2171  ;;  %v1463_v50 = vadd.f32 %v3146_v26, %v1462_v30  ;;  %2191 = vpow2.f32 %v1397_v53  ;;  %v1484_v7 = vadd.f32 %v2162_v46, %v1483_v14  ;;  %v1957_v62 = vpack.c.bf16 %v2170_v23, %v2168_v13 }
 0x350   : >> { %v1413_v57 = vmul.f32 1.442695, %v3586_v48  ;;  %1948 = vmatpush1.bf16.msra.mxu1 %v3587_v49  ;;  %v2174_v19 = vpop.eup %2173  ;;  %2193 = vpow2.f32 %v1401_v45  ;;  %v3588_v37 = vsub.f32 %v3546_v10, %v2915_v33  ;;  %v3590_v47 = vsub.f32 %v3589_v18, %v2915_v33  ;;  %v3592_v45 = vld [vmem:[#allocation29_spill] sm:$0xff] }
 0x351   : >> { %1950 = vmatprep.subr.bf16.mxu1 %v1949_v32  ;;  %v2176_v36 = vpop.eup %2175  ;;  %v1464_v59 = vadd.f32 %v3157_v60, %v1463_v50  ;;  %2195 = vpow2.f32 %v1405_v24  ;;  %v1485_v56 = vadd.f32 %v2164_v2, %v1484_v7  ;;  %v1961_v0 = vpack.c.bf16 %v2174_v19, %v2172_v9 }
 0x352   : >> { %v1417_v11 = vmul.f32 1.442695, %v3588_v37  ;;  %v1421_v3 = vmul.f32 1.442695, %v3590_v47  ;;  %v2178_v53 = vpop.eup %2177  ;;  %2197 = vpow2.f32 %v1409_v58  ;;  %v3591_v46 = vsub.f32 %v3548_v51, %v2915_v33 }
 0x353   : >> { %v3593_v10 = vsub.f32 %v3592_v45, %v2915_v33  ;;  %v3594_v30 = vpack.c.bf16 %v3038_v55, %v3031_v38  ;;  %v2180_v14 = vpop.eup %2179  ;;  %v1465_v61 = vadd.f32 %v3166_v63, %v1464_v59  ;;  %2199 = vpow2.f32 %v1413_v57 }
 0x354   : >> { %v1425_v32 = vmul.f32 1.442695, %v3591_v46  ;;  %v1486_v2 = vadd.f32 %v2166_v28, %v1485_v56  ;;  %v1965_v24 = vpack.c.bf16 %v2178_v53, %v2176_v36  ;;  %v2182_v58 = vpop.eup %2181  ;;  %2201 = vpow2.f32 %v1417_v11  ;;  %v3597_v28 = vld [vmem:[#allocation32_spill] sm:$0xff] }
 0x355   : >> { %v1429_v52 = vmul.f32 1.442695, %v3593_v10  ;;  %1952 = vmatpush1.bf16.msra.mxu1 %v3594_v30  ;;  %v3595_v51 = vsub.f32 %v3550_v21, %v2915_v33  ;;  %v3596_v49 = vsub.f32 %v3551_v31, %v2915_v33  ;;  %v2184_v7 = vpop.eup %2183  ;;  %v1466_v55 = vadd.f32 %v3174_v20, %v1465_v61 }
 0x356   : >> { %1954 = vmatprep.subr.bf16.mxu1 %v1953_v54  ;;  %2203 = vpow2.f32 %v1421_v3  ;;  %v1487_v38 = vadd.f32 %v2168_v13, %v1486_v2  ;;  %v1969_v37 = vpack.c.bf16 %v2182_v58, %v2180_v14  ;;  %v2186_v57 = vpop.eup %2185  ;;  %v3598_v54 = vsub.f32 %v3597_v28, %v2915_v33 }
 0x357   : >> { %v1433_v48 = vmul.f32 1.442695, %v3595_v51  ;;  %v1437_v50 = vmul.f32 1.442695, %v3596_v49  ;;  %2205 = vpow2.f32 %v1425_v32  ;;  %v3599_v21 = vpack.c.bf16 %v3053_v34, %v3046_v41  ;;  %v2188_v18 = vpop.eup %2187 }
 0x358   : >> { %v1441_v11 = vmul.f32 1.442695, %v3598_v54  ;;  %v1467_v31 = vadd.f32 %v3181_v42, %v1466_v55  ;;  %2207 = vpow2.f32 %v1429_v52  ;;  %v1488_v47 = vadd.f32 %v2170_v23, %v1487_v38  ;;  %v2190_v3 = vpop.eup %2189 }
 0x359   : >> { %1956 = vmatpush1.bf16.msra.mxu1 %v3599_v21  ;;  %v1973_v59 = vpack.c.bf16 %v2186_v57, %v2184_v7  ;;  %2209 = vpow2.f32 %v1433_v48  ;;  %v2192_v13 = vpop.eup %2191  ;;  %v1977_v33 = vpack.c.bf16 %v2190_v3, %v2188_v18  ;;  %v3600_v34 = vpack.c.bf16 %v3068_v35, %v3061_v22 }
 0x35a   : >> { %1958 = vmatprep.subr.bf16.mxu1 %v1957_v62  ;;  %v1468_v56 = vadd.f32 %v3189_v27, %v1467_v31  ;;  %2211 = vpow2.f32 %v1437_v50  ;;  %v1489_v46 = vadd.f32 %v2172_v9, %v1488_v47  ;;  %v2194_v32 = vpop.eup %2193  ;;  %v3601_v51 = vpack.c.bf16 %v3082_v5, %v3076_v25 }
 0x35b   : >> { %2213 = vpow2.f32 %v1441_v11  ;;  %v2196_v41 = vpop.eup %2195  ;;  %v1981_v62 = vpack.c.bf16 %v2194_v32, %v2192_v13  ;;  %v3603_v31 = vpack.c.bf16 %v3107_v44, %v3101_v6  ;;  %v3607_v6 = vpack.c.bf16 %v3146_v26, %v3137_v4 }
 0x35c   : >> { %v1469_v45 = vadd.f32 %v3196_v43, %v1468_v56  ;;  %v1490_v23 = vadd.f32 %v2174_v19, %v1489_v46  ;;  %v2198_v10 = vpop.eup %2197  ;;  %v3604_v56 = vld [vmem:[#allocation15_spill] sm:$0xff]  ;;  %v3610_v4 = vpack.c.bf16 %v3196_v43, %v3189_v27 }
 0x35d   : >> { %1960 = vmatpush1.bf16.msra.mxu1 %v3600_v34  ;;  %v2200_v52 = vpop.eup %2199  ;;  %v1985_v2 = vpack.c.bf16 %v2198_v10, %v2196_v41 }
 0x35e   : >> { %1962 = vmatprep.subr.bf16.mxu1 %v1961_v0  ;;  %v1470_v30 = vadd.f32 %v3204_v39, %v1469_v45  ;;  %v1491_v61 = vadd.f32 %v2176_v36, %v1490_v23  ;;  %v2202_v9 = vpop.eup %2201  ;;  %v3602_v36 = vpack.c.bf16 %v3095_v17, %v3088_v15  ;;  %v3605_v15 = vpack.c.bf16 %v3118_v8, %v3604_v56 }
 0x35f   : >> { %v1989_v49 = vpack.c.bf16 %v2202_v9, %v2200_v52  ;;  %v3608_v8 = vpack.c.bf16 %v3166_v63, %v3157_v60  ;;  %v3611_v60 = vpack.c.bf16 %v3212_v40, %v3204_v39 }
 0x360   : >> { %v2204_v48 = vpop.eup %2203  ;;  %v1471_v35 = vadd.f32 %v3212_v40, %v1470_v30  ;;  %v1492_v22 = vadd.f32 %v2178_v53, %v1491_v61 }
 0x361   : >> { %1964 = vmatpush1.bf16.msra.mxu1 %v3601_v51  ;;  %v2206_v19 = vpop.eup %2205 }
 0x362   : >> { %1966 = vmatprep.subr.bf16.mxu1 %v1965_v24  ;;  %v2208_v0 = vpop.eup %2207  ;;  %v1472_v50 = vadd.f32 %v3217_v1, %v1471_v35  ;;  %v1493_v55 = vadd.f32 %v2180_v14, %v1492_v22  ;;  %v1993_v38 = vpack.c.bf16 %v2206_v19, %v2204_v48  ;;  %v3613_v35 = vmov (%p731_p11), 0.0  }
 0x363   : >> { %v2210_v28 = vpop.eup %2209  ;;  %1717 = vmatprep.mubr.f32.mxu0 (%p731_p11), %v3613_v35 }
 0x364   : >> { %v2212_v54 = vpop.eup %2211  ;;  %v1473_v5 = vadd.f32 %v3225_v12, %v1472_v50  ;;  %v1494_v25 = vadd.f32 %v2182_v58, %v1493_v55  ;;  %v1997_v11 = vpack.c.bf16 %v2210_v28, %v2208_v0  ;;  %v3606_v58 = vpack.c.bf16 %v3129_v29, %v3123_v16 }
 0x365   : >> { %1968 = vmatpush1.bf16.msra.mxu1 %v3602_v36  ;;  %v2214_v53 = vpop.eup %2213  ;;  %v3609_v16 = vpack.c.bf16 %v3181_v42, %v3174_v20  ;;  %v3612_v20 = vpack.c.bf16 %v3225_v12, %v3217_v1  ;;  %v757_v42 = vld [vmem:[%s2910_s8] sm:$0xff]  ;;  %v3614_v50 = vmov (%p731_p11), 0  }
 0x366   : >> { %1970 = vmatprep.subr.bf16.mxu1 %v1969_v37  ;;  %v1495_v24 = vadd.f32 %v2184_v7, %v1494_v25  ;;  %v2001_v21 = vpack.c.bf16 %v2214_v53, %v2212_v54  ;;  %2220 = vset.pattern.permute.xlu1 (%p731_p11), %v3614_v50 }
 0x367   : > { %2219 = vset.pattern.permute.xlu0 (%p731_p11), %v3614_v50 }
 0x368   : >> { %v1496_v14 = vadd.f32 %v2186_v57, %v1495_v24 }
 0x369   : >> { %1972 = vmatpush1.bf16.msra.mxu1 %v3603_v31 }
 0x36a   : >> { %1974 = vmatprep.subr.bf16.mxu1 %v1973_v59  ;;  %v1497_v47 = vadd.f32 %v2188_v18, %v1496_v14  ;;  %v1618_v14 = vld [vmem:[%s3457_s4 + $0x10] sm:$0xff] (%p731_p11) }
 0x36b   : > { %1632 = vperm.xlu1 (%p731_p11), %2220, %v1618_v14  }
 0x36c   : >> { %v1498_v17 = vadd.f32 %v2190_v3, %v1497_v47  ;;  %v1616_v47 = vld [vmem:[%s3457_s4] sm:$0xff] (%p731_p11) }
 0x36d   : >> { %1976 = vmatpush1.bf16.msra.mxu1 %v3605_v15  ;;  %v1619_v15 = vld [vmem:[%s3457_s4 + $0x18] sm:$0xff] (%p731_p11)  ;;  %1622 = vperm.xlu0 (%p731_p11), %2219, %v1616_v47  }
 0x36e   : >> { %1978 = vmatprep.subr.bf16.mxu1 %v1977_v33  ;;  %v1499_v46 = vadd.f32 %v2192_v13, %v1498_v17  ;;  %v1474_v33 = vrot.slane %v1473_v5, 4 }
 0x36f   : > { %1637 = vperm.xlu1 (%p731_p11), %2220, %v1619_v15  }
 0x370   : >> { %v1500_v7 = vadd.f32 %v2194_v32, %v1499_v46  ;;  %v1475_v34 = vadd.f32 %v1474_v33, %v1473_v5  ;;  %v3616_v33 = vld [vmem:[#allocation13_spill] sm:$0xff] (%p731_p11) }
 0x371   : >> { %1980 = vmatpush1.bf16.msra.mxu1 %v3606_v58 }
 0x372   : >> { %1982 = vmatprep.subr.bf16.mxu1 %v1981_v62  ;;  %v1501_v37 = vadd.f32 %v2196_v41, %v1500_v7  ;;  %v1476_v27 = vrot.slane %v1475_v34, 2  ;;  %v1617_v7 = vld [vmem:[%s3457_s4 + $0x8] sm:$0xff] (%p731_p11) }
 0x373   : > { %1627 = vperm.xlu0 (%p731_p11), %2219, %v1617_v7  }
 0x374   : >> { %v1502_v44 = vadd.f32 %v2198_v10, %v1501_v37  ;;  %v1477_v45 = vadd.f32 %v1476_v27, %v1475_v34  ;;  %v3617_v27 = vld [vmem:[#allocation7_spill] sm:$0xff] (%p731_p11) }
 0x375   : >> { %1984 = vmatpush1.bf16.msra.mxu1 %v3607_v6  ;;  %v1596_v6 = vld [vmem:[%s3456_s3] sm:$0xff] (%p731_p11) }
 0x376   : >> { %1986 = vmatprep.subr.bf16.mxu1 %v1985_v2  ;;  %v1503_v57 = vadd.f32 %v2200_v52, %v1502_v44  ;;  %v1478_v62 = vrot.slane %v1477_v45, 1  ;;  %v1598_v44 = vld [vmem:[%s3456_s3 + $0x10] sm:$0xff] (%p731_p11) }
 0x378   : >> { %v1504_v18 = vadd.f32 %v2202_v9, %v1503_v57  ;;  %v1479_v39 = vadd.f32 %v1478_v62, %v1477_v45  ;;  %v1597_v57 = vld [vmem:[%s3456_s3 + $0x8] sm:$0xff] (%p731_p11)  ;;  %v3618_v45 = vld [vmem:[#allocation11_spill] sm:$0xff] (%p731_p11) }
 0x379   : >> { %1988 = vmatpush1.bf16.msra.mxu1 %v3608_v8  ;;  %v1599_v8 = vld [vmem:[%s3456_s3 + $0x18] sm:$0xff] (%p731_p11) }
 0x37a   : >> { %1990 = vmatprep.subr.bf16.mxu1 %v1989_v49  ;;  %v1505_v59 = vadd.f32 %v2204_v48, %v1504_v18  ;;  %2215 = vrcp.f32 %v1479_v39 }
 0x37c   : >> { %v1506_v29 = vadd.f32 %v2206_v19, %v1505_v59 }
 0x37d   : >> { %1992 = vmatpush1.bf16.msra.mxu1 %v3609_v16 }
 0x37e   : >> { %1994 = vmatprep.subr.bf16.mxu1 %v1993_v38  ;;  %v1507_v3 = vadd.f32 %v2208_v0, %v1506_v29 }
 0x380   : >> { %v1508_v26 = vadd.f32 %v2210_v28, %v1507_v3 }
 0x381   : >> { %1996 = vmatpush1.bf16.msra.mxu1 %v3610_v4 }
 0x382   : >> { %1998 = vmatprep.subr.bf16.mxu1 %v1997_v11  ;;  %v1509_v13 = vadd.f32 %v2212_v54, %v1508_v26 }
 0x384   : >> { %v1510_v63 = vadd.f32 %v2214_v53, %v1509_v13  ;;  %v2216_v52 = vpop.eup %2215 }
 0x385   : >> { %2000 = vmatpush1.bf16.msra.mxu1 %v3611_v60 }
 0x386   : >> { %2002 = vmatprep.subr.bf16.mxu1 %v2001_v21  ;;  %v1511_v32 = vrot.slane %v1510_v63, 4 }
 0x388   : >> { %v1512_v43 = vadd.f32 %v1511_v32, %v1510_v63 }
 0x389   : >> { %2004 = vmatpush1.bf16.msra.mxu1 %v3612_v20  ;;  %v3615_v20 = vld [vmem:[#allocation9_spill] sm:$0xff] (%p731_p11) }
 0x38a   : >> { %v1513_v41 = vrot.slane %v1512_v43, 2 }
 0x38c   : >> { %1584 = vmatmul.mubr.f32.vlgmr.msra.gmra.mrb[0].mxu1 %v757_v42  ;;  %v1514_v23 = vadd.f32 %v1513_v41, %v1512_v43 }
 0x38d   : > { %1729 = vmatprep.mubr.f32.mxu1 (%p731_p11), %v3613_v35 }
 0x38e   : >> { %v1515_v40 = vrot.slane %v1514_v23, 1 }
 0x390   : >> { %v1516_v10 = vadd.f32 %v1515_v40, %v1514_v23 }
 0x392   : >> { %2217 = vrcp.f32 %v1516_v10 }
 0x39c   : >> { %v2218_v12 = vpop.eup %2217 }
 0x3ea   : > { %v1633_v18 = vpop.permute.xlu1 (%p731_p11), %1632 }
 0x3ec   : > { %v1623_v59 = vpop.permute.xlu0 (%p731_p11), %1622 }
 0x3ee   : > { %v1638_v34 = vpop.permute.xlu1 (%p731_p11), %1637 }
 0x3f2   : > { %v1628_v43 = vpop.permute.xlu0 (%p731_p11), %1627 }
 0x45d   : > { %733 = sbr.rel (!%p731_p11) target bundleno = 298 (0x12a), region = 86 }
 0x45f   : >> { %v1585_v1 = vpop.f32.mrb[0].mxu1 }
 0x460   : >> { %v1590_v30 = vmul.f32 %v2216_v52, %v1585_v1  ;;  %v1587_v61 = vpop.f32.mrb[1].mxu1 }
 0x461   : >> { %v1591_v2 = vmul.f32 %v2218_v12, %v1587_v61  ;;  %v3619_v61 = vld [vmem:[#allocation10_spill] sm:$0xff] (%p731_p11) }
 0x462   : >> { %1594 = vst [vmem:[%s1593_s9] sm:$0xff] %v1590_v30 }
 0x463   : >> { %1595 = vst [vmem:[%s1593_s9 + $0x8] sm:$0xff] %v1591_v2 }
 0x46a   : > { %v1601_v9 = vld [vmem:[#allocation3 + $0x8] sm:$0xff]  ;;  %v1603_v51 = vld [vmem:[#allocation3 + $0x18] sm:$0xff]  ;;  %v1600_v48 = vld [vmem:[#allocation3] sm:$0xff] }
 0x46b   : > { %v2005_v22 = vpack.c.bf16 %v1603_v51, %v1601_v9  ;;  %v1602_v49 = vld [vmem:[#allocation3 + $0x10] sm:$0xff]  ;;  %v1605_v19 = vld [vmem:[#allocation3 + $0x28] sm:$0xff]  ;;  %v1607_v0 = vld [vmem:[#allocation3 + $0x38] sm:$0xff] }
 0x46c   : > { %v2007_v55 = vpack.c.bf16 %v1602_v49, %v1600_v48  ;;  %v2009_v38 = vpack.c.bf16 %v1607_v0, %v1605_v19  ;;  %v1604_v28 = vld [vmem:[#allocation3 + $0x20] sm:$0xff]  ;;  %v1606_v36 = vld [vmem:[#allocation3 + $0x30] sm:$0xff]  ;;  %v1609_v54 = vld [vmem:[#allocation3 + $0x48] sm:$0xff] }
 0x46d   : > { %2006 = vmatprep.subr.bf16.mxu0 %v2005_v22  ;;  %2025 = vmatprep.subr.bf16.mxu1 %v2005_v22  ;;  %v1611_v5 = vld [vmem:[#allocation3 + $0x58] sm:$0xff]  ;;  %v2011_v25 = vpack.c.bf16 %v1606_v36, %v1604_v28  ;;  %v1608_v53 = vld [vmem:[#allocation3 + $0x40] sm:$0xff]  ;;  %v1610_v24 = vld [vmem:[#allocation3 + $0x50] sm:$0xff] }
 0x46e   : > { %2008 = vmatpush1.bf16.msra.mxu0 %v2007_v55  ;;  %2029 = vmatpush1.bf16.msra.mxu1 %v2007_v55  ;;  %v2013_v11 = vpack.c.bf16 %v1611_v5, %v1609_v54  ;;  %v1613_v21 = vld [vmem:[#allocation3 + $0x68] sm:$0xff]  ;;  %v1615_v31 = vld [vmem:[#allocation3 + $0x78] sm:$0xff]  ;;  %v2015_v56 = vpack.c.bf16 %v1610_v24, %v1608_v53  ;;  %v1612_v46 = vld [vmem:[#allocation3 + $0x60] sm:$0xff] }
 0x46f   : > { %2010 = vmatprep.subr.bf16.mxu0 %v2009_v38  ;;  %2026 = vmatprep.subr.bf16.mxu1 %v2009_v38  ;;  %v2017_v17 = vpack.c.bf16 %v1615_v31, %v1613_v21  ;;  %v1614_v58 = vld [vmem:[#allocation3 + $0x70] sm:$0xff]  ;;  %v3620_v9 = vld [vmem:[#allocation14_spill] sm:$0xff]  ;;  %v3621_v48 = vld [vmem:[#allocation8_spill] sm:$0xff] }
 0x470   : > { %v2019_v37 = vpack.c.bf16 %v1614_v58, %v1612_v46  ;;  %v3622_v22 = vld [vmem:[#allocation12_spill] sm:$0xff] }
 0x472   : > { %2012 = vmatpush1.bf16.msra.mxu0 %v2011_v25  ;;  %2030 = vmatpush1.bf16.msra.mxu1 %v2011_v25 }
 0x473   : > { %2014 = vmatprep.subr.bf16.mxu0 %v2013_v11  ;;  %2027 = vmatprep.subr.bf16.mxu1 %v2013_v11 }
 0x476   : > { %2016 = vmatpush1.bf16.msra.mxu0 %v2015_v56  ;;  %2031 = vmatpush1.bf16.msra.mxu1 %v2015_v56 }
 0x477   : > { %2018 = vmatprep.subr.bf16.mxu0 %v2017_v17  ;;  %2028 = vmatprep.subr.bf16.mxu1 %v2017_v17 }
 0x47a   : > { %2020 = vmatpush1.bf16.msra.mxu0 %v2019_v37  ;;  %2032 = vmatpush1.bf16.msra.mxu1 %v2019_v37 }
 0x47d   : > { %1918 = vmatmul.mubr.msk.f32.vlgmr.msra.gmra.mrb[0].mxu0 %vm1640_vm2, %v1596_v6  ;;  %1920 = vmatmul.mubr.msk.f32.vlgmr.msra.gmra.mrb[0].mxu1 %vm1640_vm2, %v1598_v44 }
 0x47e   : > { %1723 = vmatprep.mubr.f32.mxu0 %v3613_v35  ;;  %1735 = vmatprep.mubr.f32.mxu1 %v3613_v35 }
 0x481   : > { %1919 = vmatmul.mubr.msk.f32.gmra.mrb[2].mxu0 %vm1640_vm2, %v1597_v57  ;;  %1921 = vmatmul.mubr.msk.f32.gmra.mrb[2].mxu1 %vm1640_vm2, %v1599_v8 }
 0x550   : > { %v1719_v16 = vpop.f32.mrb[0].mxu0  ;;  %v1731_v29 = vpop.f32.mrb[0].mxu1 }
 0x551   : > { %v1720_v3 = vadd.f32 %v1719_v16, %v1623_v59  ;;  %v1732_v4 = vadd.f32 %v1731_v29, %v1633_v18  ;;  %v1721_v26 = vpop.f32.mrb[1].mxu0  ;;  %v1733_v13 = vpop.f32.mrb[1].mxu1 }
 0x552   : > { %v1722_v60 = vadd.f32 %v1721_v26, %v1623_v59  ;;  %v1734_v63 = vadd.f32 %v1733_v13, %v1633_v18 }
 0x553   : > { %v1742_v42 = vadd.f32 %v1720_v3, %v3615_v20  ;;  %v1746_v32 = vadd.f32 %v1732_v4, %v3616_v33 }
 0x554   : > { %v1743_v41 = vadd.f32 %v1722_v60, %v3617_v27  ;;  %v1747_v23 = vadd.f32 %v1734_v63, %v3618_v45  ;;  %v1725_v62 = vpop.f32.mrb[2].mxu0  ;;  %v1737_v40 = vpop.f32.mrb[2].mxu1 }
 0x555   : > { %1750 = vst [vmem:[%s2638_s10] sm:$0xff] %v1742_v42  ;;  %1754 = vst [vmem:[%s2638_s10 + $0x20] sm:$0xff] %v1746_v32  ;;  %v1726_v39 = vadd.f32 %v1725_v62, %v1628_v43  ;;  %v1738_v10 = vadd.f32 %v1737_v40, %v1638_v34  ;;  %v1727_v52 = vpop.f32.mrb[3].mxu0  ;;  %v1739_v1 = vpop.f32.mrb[3].mxu1 }
 0x556   : > { %1751 = vst [vmem:[%s2638_s10 + $0x8] sm:$0xff] %v1743_v41  ;;  %1755 = vst [vmem:[%s2638_s10 + $0x28] sm:$0xff] %v1747_v23  ;;  %v1728_v12 = vadd.f32 %v1727_v52, %v1628_v43  ;;  %v1740_v30 = vadd.f32 %v1739_v1, %v1638_v34 }
 0x557   : > { %v1744_v2 = vadd.f32 %v1726_v39, %v3619_v61  ;;  %v1748_v51 = vadd.f32 %v1738_v10, %v3620_v9 }
 0x558   : > { %v1745_v35 = vadd.f32 %v1728_v12, %v3621_v48  ;;  %v1749_v49 = vadd.f32 %v1740_v30, %v3622_v22 }
 0x559   : > { %1752 = vst [vmem:[%s2638_s10 + $0x10] sm:$0xff] %v1744_v2  ;;  %1756 = vst [vmem:[%s2638_s10 + $0x30] sm:$0xff] %v1748_v51 }
 0x55a   : > { %1753 = vst [vmem:[%s2638_s10 + $0x18] sm:$0xff] %v1745_v35  ;;  %1757 = vst [vmem:[%s2638_s10 + $0x38] sm:$0xff] %v1749_v49 }
 0x55b   : > { %2234 = shalt.err (!%p2231_p4)
}
 0x55c   : > { %s2235_s30 = scalar_lea.hbm %s3400_s6, 1024  ;;  %s2239_s8 = scalar_lea.hbm %s3458_s5, 2048 }
 0x55d   : > { %p2236_p7 = scmp.ne.s32.totalorder %s3400_s6, %s2235_s30  ;;  %p2240_p10 = scmp.lt.u32.totalorder %s3400_s6, %s3458_s5 }
 0x55e   : > { %p2241_p11 = scmp.lt.u32.totalorder %s2239_s8, %s2235_s30  ;;  %p2243_p13 = scmp.lt.u32.totalorder %s2235_s30, %s3400_s6 }
 0x55f   : > { %p2237_p8 = pnand %p2236_p7, %p2367_p5 }
 0x560   : > { %p2242_p12 = por %p2241_p11, %p2240_p10 }
 0x561   : > { %p2238_p9 = pneg %p2237_p8 }
 0x562   : > { %p2244_p0 = por %p2243_p13, %p2242_p12 }
 0x564   : > { %p2245_p1 = pnand %p2244_p0, %p2238_p9 }
 0x566   : > { %2248 = shalt.err (!%p2245_p1)
}
 0x567   : > { %s2297_s12 = smov 256   ;;  %s2298_s13 = smov 16  }
 0x568   : > { %2033 = dma.vmem_to_hbm [thread:$0]  (%p2367_p5), %s3402_s14, 1024, %s3400_s6, %s3412_s16, %s2297_s12, %s2297_s12, %s2298_s13  }
 0x569 PF: > { %p2039_p2 = scmp.ge.s32.totalorder %s2287_s21, 2  ;;  %s1787_s22 = sand.u32 1, %s2275_s18  }
 0x56a   : > { %s1788_s15 = scalar_lea.sflag [#allocation5], %s1787_s22 }
 0x56b   : > { %p2036_p3 = pnand %p2039_p2, %p2371_p6 }
 0x56d   : > { %2270 = dma.done.wait (!%p2036_p3), %s1788_s15, 1024  }
 0x56e   : > { %2272 = vsyncadd (!%p2036_p3), %s1788_s15, 4294966272  ;;  %p15_p4 = scmp.ge.s32.totalorder %s2354_s24, 4   ;;  %s3623_s18 = smov %s2279_s19 }
 0x56f   : > { %s3624_s19 = smov %s2283_s20  ;;  %s3625_s20 = smov %s2365_s27 }
 0x570   : > { %s3626_s21 = smov %s2354_s24  ;;  %17 = sbr.rel (!%p15_p4) target bundleno = 3 (0x3), region = 97 }
 0x577   :  { %1793 = vsyncpa [#allocation5], 1 }
 0x578   :  { %1795 = vsyncpa [#allocation5 + $0x1], 1 }

</bundles_post_ra>
